<compile_context>
chip_gen: v6e
topology: v6e:2x2x1
jax: 0.10.0
libtpu: 0.0.40
codegen_flags: <defaults>
</compile_context>

<pallas_src>
import math

import jax
import jax.numpy as jnp
from jax import lax
from jax.experimental import pallas as pl
from jax.experimental.pallas import tpu as pltpu

EPS = 1e-5  # default eps of GroupNorm / InstanceNorm1d


def _silu(x):
    return x * (1.0 / (1.0 + jnp.exp(-x)))


def _softplus(x):
    # torch.nn.Softplus(beta=1, threshold=20)
    return jnp.where(x > 20.0, x, jnp.log1p(jnp.exp(jnp.minimum(x, 20.0))))


def ssm_block_kernel(
    x_ref,                       # (1, L, F)  f32
    w_in_ref, b_in_ref,          # (F, Fi) bf16, (1, Fi) f32
    cw0_ref, cw1_ref, cw2_ref,   # (Fi, Fi) bf16 each: Conv1d taps k=0,1,2 (pre-transposed)
    cb_ref,                      # (1, Fi) f32
    a_t_ref,                     # (N, Fi) f32  == exp(A_log).T  (precomputed in wrapper)
    d_ref,                       # (1, Fi) f32
    wbcd_ref, bbcd_ref,          # (Fi, 2N+nd) bf16, (1, 2N+nd) f32  (fused B | C | Δ1)
    wd2_ref, bd2_ref,            # (nd, Fi) bf16, (1, Fi) f32
    wo_ref, bo_ref,              # (Fi, F) bf16, (1, F) f32
    o_ref,                       # (1, L, F) f32
    delta_ref,                   # VMEM (L, Fi) f32 scratch  (Δ)
    dh_ref,                      # VMEM (L, Fi) f32 scratch  (Δ * h)
    bm_ref,                      # VMEM (L, N)  f32 scratch  (B)
    cm_ref,                      # VMEM (L, N)  f32 scratch  (C)
    y_ref,                       # VMEM (L, Fi) f32 scratch  (scan output)
):
    bf16 = jnp.bfloat16
    x = x_ref[0]                                  # (L, F) f32
    seq_len = x.shape[0]
    n_states = a_t_ref.shape[0]
    n_inner = d_ref.shape[1]

    # ---- project_in: GroupNorm(1, F, affine=False) over (L, F), then Linear ----
    mu = jnp.mean(x)
    var = jnp.mean((x - mu) ** 2)
    xn = (x - mu) * lax.rsqrt(var + EPS)
    h0 = jnp.dot(xn.astype(bf16), w_in_ref[...],
                 preferred_element_type=jnp.float32) + b_in_ref[...]        # (L, Fi) f32

    # ---- conv_block: Conv1d(k=3, pad=1) along seq via 3 shifted matmuls,
    #      InstanceNorm1d over seq, SiLU ----
    # (For Fi < 256 on v6e/v7x a single concat-K matmul would fill the 256-wide MXU
    #  better; kept the chip-agnostic 3-tap form.)
    row = lax.broadcasted_iota(jnp.int32, (seq_len, 1), 0)
    h_prev = jnp.where(row == 0, 0.0, pltpu.roll(h0, shift=1, axis=0))
    h_next = jnp.where(row == seq_len - 1, 0.0,
                       pltpu.roll(h0, shift=seq_len - 1, axis=0))
    hc = (
        jnp.dot(h_prev.astype(bf16), cw0_ref[...], preferred_element_type=jnp.float32)
        + jnp.dot(h0.astype(bf16), cw1_ref[...], preferred_element_type=jnp.float32)
        + jnp.dot(h_next.astype(bf16), cw2_ref[...], preferred_element_type=jnp.float32)
        + cb_ref[...]
    )
    mu_l = jnp.mean(hc, axis=0, keepdims=True)
    var_l = jnp.mean((hc - mu_l) ** 2, axis=0, keepdims=True)
    h = _silu((hc - mu_l) * lax.rsqrt(var_l + EPS))                         # (L, Fi) f32

    # ---- ssm projections: one fused wide MXU matmul for B | C | Δ1, then Δ2 ----
    h_b = h.astype(bf16)
    proj = jnp.dot(h_b, wbcd_ref[...], preferred_element_type=jnp.float32) + bbcd_ref[...]
    bm = proj[:, :n_states]                                                 # (L, N)
    cm = proj[:, n_states:2 * n_states]                                     # (L, N)
    d1 = proj[:, 2 * n_states:]                                             # (L, nd)
    delta = _softplus(
        jnp.dot(d1.astype(bf16), wd2_ref[...], preferred_element_type=jnp.float32)
        + bd2_ref[...]
    )                                                                        # (L, Fi)

    # ---- stash small per-timestep scan inputs (written once; O(L*(Fi+N)) traffic,
    #      vs. the old O(L*N*Fi) A_bar/BX scratch) ----
    delta_ref[...] = delta
    dh_ref[...] = delta * h
    bm_ref[...] = bm
    cm_ref[...] = cm

    # ---- selective scan ----
    # Outer static loop over Fi tiles: the (N, fw) state stays vreg-resident.
    # Inner fori_loop over 8-row chunks; A_bar / BX computed per row on the fly
    # (exp runs on the EUP slot, overlapped with scan VALU work).
    CHUNK = 8
    n_full = seq_len // CHUNK
    rem = seq_len % CHUNK
    TILE_F = 256

    for f0 in range(0, n_inner, TILE_F):
        fw = min(TILE_F, n_inner - f0)
        a_tile = a_t_ref[:, pl.ds(f0, fw)]                                  # (N, fw)

        def scan_rows(base, count, state, a_tile=a_tile, f0=f0, fw=fw):
            d_blk = delta_ref[pl.ds(base, count), pl.ds(f0, fw)]            # (count, fw)
            dh_blk = dh_ref[pl.ds(base, count), pl.ds(f0, fw)]              # (count, fw)
            b_blk = bm_ref[pl.ds(base, count), :]                           # (count, N)
            c_blk = cm_ref[pl.ds(base, count), :]                           # (count, N)
            rows = []
            for j in range(count):                  # static unroll within chunk
                a_j = jnp.exp(-d_blk[j][None, :] * a_tile)                  # (N, fw)
                state = a_j * state + dh_blk[j][None, :] * b_blk[j][:, None]
                rows.append(jnp.sum(state * c_blk[j][:, None], axis=0, keepdims=True))
            y_ref[pl.ds(base, count), pl.ds(f0, fw)] = jnp.concatenate(rows, axis=0)
            return state

        def chunk_body(c, state):
            return scan_rows(pl.multiple_of(c * CHUNK, CHUNK), CHUNK, state)

        state = jnp.zeros((n_states, fw), dtype=jnp.float32)
        if n_full > 0:
            state = lax.fori_loop(0, n_full, chunk_body, state)
        if rem > 0:                                 # static tail (one sub-8-row store)
            scan_rows(n_full * CHUNK, rem, state)

    y = y_ref[...] + d_ref[...] * h                                          # (L, Fi)

    # ---- gate with silu(h0); project_out: InstanceNorm over features, Linear, residual ----
    g = y * _silu(h0)
    mu_f = jnp.mean(g, axis=1, keepdims=True)
    var_f = jnp.mean((g - mu_f) ** 2, axis=1, keepdims=True)
    gn = (g - mu_f) * lax.rsqrt(var_f + EPS)
    out = jnp.dot(gn.astype(bf16), wo_ref[...],
                  preferred_element_type=jnp.float32) + bo_ref[...] + x
    o_ref[0] = out.astype(o_ref.dtype)


def init_params(key, n_features, n_states, expansion=1):
    n_features_inner = int(n_features * expansion)
    n_delta = math.ceil(n_features / 16)
    ks = jax.random.split(key, 8)

    def linear(k, fan_in, fan_out):
        bound = 1.0 / math.sqrt(fan_in)
        kw, kb = jax.random.split(k)
        w = jax.random.uniform(kw, (fan_out, fan_in), jnp.float32, -bound, bound)
        b = jax.random.uniform(kb, (fan_out,), jnp.float32, -bound, bound)
        return w, b

    w_in, b_in = linear(ks[0], n_features, n_features_inner)
    cbound = 1.0 / math.sqrt(n_features_inner * 3)
    kcw, kcb = jax.random.split(ks[1])
    conv_w = jax.random.uniform(kcw, (n_features_inner, n_features_inner, 3),
                                jnp.float32, -cbound, cbound)
    conv_b = jax.random.uniform(kcb, (n_features_inner,), jnp.float32, -cbound, cbound)
    w_b, b_b = linear(ks[2], n_features_inner, n_states)
    w_c, b_c = linear(ks[3], n_features_inner, n_states)
    w_d1, b_d1 = linear(ks[4], n_features_inner, n_delta)
    w_d2, b_d2 = linear(ks[5], n_delta, n_features_inner)
    w_out, b_out = linear(ks[6], n_features_inner, n_features)
    a_log = jnp.log(jnp.tile(jnp.arange(1, n_states + 1, dtype=jnp.float32)[None, :],
                             (n_features_inner, 1)))
    d = jnp.ones((n_features_inner,), jnp.float32)
    return dict(w_in=w_in, b_in=b_in, conv_w=conv_w, conv_b=conv_b,
                w_b=w_b, b_b=b_b, w_c=w_c, b_c=b_c,
                w_d1=w_d1, b_d1=b_d1, w_d2=w_d2, b_d2=b_d2,
                w_out=w_out, b_out=b_out, a_log=a_log, d=d)


def ssm_block_forward(x, prm):
    B, L, F = x.shape
    Fi = prm["w_in"].shape[0]
    N = prm["w_b"].shape[0]
    bf16 = jnp.bfloat16

    # Fused narrow projection weight: [B | C | Δ1] -> (Fi, 2N+nd).
    wbcd = jnp.concatenate([prm["w_b"].T, prm["w_c"].T, prm["w_d1"].T], axis=1).astype(bf16)
    bbcd = jnp.concatenate([prm["b_b"], prm["b_c"], prm["b_d1"]])[None, :]

    # Big matmul weights pre-cast to bf16 (f32 accumulation in-kernel); biases,
    # exp(A_log).T and D stay f32.
    params = [
        prm["w_in"].T.astype(bf16), prm["b_in"][None, :],
        prm["conv_w"][:, :, 0].T.astype(bf16),
        prm["conv_w"][:, :, 1].T.astype(bf16),
        prm["conv_w"][:, :, 2].T.astype(bf16),
        prm["conv_b"][None, :],
        jnp.exp(prm["a_log"]).T,                 # exp precomputed once in the wrapper
        prm["d"][None, :],
        wbcd, bbcd,
        prm["w_d2"].T.astype(bf16), prm["b_d2"][None, :],
        prm["w_out"].T.astype(bf16), prm["b_out"][None, :],
    ]
    in_specs = [pl.BlockSpec((1, L, F), lambda b: (b, 0, 0))]
    # Weights are grid-invariant (index_map -> (0,0)); Pallas does not re-DMA them.
    in_specs += [pl.BlockSpec(p.shape, lambda b: (0, 0)) for p in params]

    # Right-size scoped VMEM: weights (x2 buffers) + IO blocks + scratch + activation
    # headroom, clamped to [32 MiB, 64 MiB] (64 MiB = v7x physical).
    weight_bytes = sum(int(p.size) * p.dtype.itemsize for p in params)
    scratch_bytes = (3 * L * Fi + 2 * L * N) * 4
    io_bytes = 2 * (L * F * 4) * 2
    act_headroom = 12 * L * Fi * 4
    est = 2 * weight_bytes + scratch_bytes + io_bytes + act_headroom
    vmem_limit = int(min(64 * 2**20, max(32 * 2**20, est)))

    return pl.pallas_call(
        ssm_block_kernel,
        out_shape=jax.ShapeDtypeStruct((B, L, F), jnp.float32),
        grid_spec=pltpu.PrefetchScalarGridSpec(
            num_scalar_prefetch=0,
            grid=(B,),
            in_specs=in_specs,
            out_specs=pl.BlockSpec((1, L, F), lambda b: (b, 0, 0)),
            scratch_shapes=[
                pltpu.VMEM((L, Fi), jnp.float32),   # delta
                pltpu.VMEM((L, Fi), jnp.float32),   # delta * h
                pltpu.VMEM((L, N), jnp.float32),    # B
                pltpu.VMEM((L, N), jnp.float32),    # C
                pltpu.VMEM((L, Fi), jnp.float32),   # y
            ],
        ),
        compiler_params=pltpu.CompilerParams(
            dimension_semantics=("parallel",),
            vmem_limit_bytes=vmem_limit,
        ),
    )(x, *params)


def ssm_block_reference(x, prm):
    """Pure-JAX reference mirroring the PyTorch forward (for validation)."""
    B, L, F = x.shape
    mu = jnp.mean(x, axis=(1, 2), keepdims=True)
    var = jnp.mean((x - mu) ** 2, axis=(1, 2), keepdims=True)
    xn = (x - mu) / jnp.sqrt(var + EPS)
    h0 = xn @ prm["w_in"].T + prm["b_in"]
    hp = jnp.pad(h0, ((0, 0), (1, 1), (0, 0)))
    hc = (hp[:, 0:L] @ prm["conv_w"][:, :, 0].T
          + hp[:, 1:L + 1] @ prm["conv_w"][:, :, 1].T
          + hp[:, 2:L + 2] @ prm["conv_w"][:, :, 2].T
          + prm["conv_b"])
    mu_l = jnp.mean(hc, axis=1, keepdims=True)
    var_l = jnp.mean((hc - mu_l) ** 2, axis=1, keepdims=True)
    h = _silu((hc - mu_l) / jnp.sqrt(var_l + EPS))
    A = jnp.exp(prm["a_log"])
    Bm = h @ prm["w_b"].T + prm["b_b"]
    Cm = h @ prm["w_c"].T + prm["b_c"]
    Delta = _softplus((h @ prm["w_d1"].T + prm["b_d1"]) @ prm["w_d2"].T + prm["b_d2"])
    A_bar = jnp.exp(-Delta[..., None] * A)
    BX = Delta[..., None] * Bm[:, :, None, :] * h[..., None]
    s = jnp.zeros((B, h.shape[-1], A.shape[-1]))
    states = []
    for t in range(L):
        s = A_bar[:, t] * s + BX[:, t]
        states.append(s)
    states = jnp.stack(states, axis=1)
    y = jnp.einsum("blfn,bln->blf", states, Cm) + prm["d"] * h
    g = y * _silu(h0)
    mu_f = jnp.mean(g, axis=2, keepdims=True)
    var_f = jnp.mean((g - mu_f) ** 2, axis=2, keepdims=True)
    gn = (g - mu_f) / jnp.sqrt(var_f + EPS)
    return gn @ prm["w_out"].T + prm["b_out"] + x


def _run_case(seed, B, L, F, n_states, expansion):
    key = jax.random.PRNGKey(seed)
    kx, kp = jax.random.split(key)
    x = jax.random.normal(kx, (B, L, F), jnp.float32)
    prm = init_params(kp, F, n_states, expansion=expansion)
    out = jax.block_until_ready(ssm_block_forward(x, prm))
    assert out.shape == (B, L, F) and out.dtype == jnp.float32
    ref = ssm_block_reference(x, prm)
    err = float(jnp.max(jnp.abs(out - ref)))
    assert err < 5e-2, f"kernel/reference mismatch (B={B},L={L},F={F}): max abs err = {err}"


if __name__ == "__main__":
    # Case 1: single full chunk (L=8), Fi == F.
    _run_case(seed=0, B=2, L=8, F=16, n_states=4, expansion=1)
    # Case 2: multi-chunk scan + static tail (L=20 -> 2 full chunks + 4-row tail),
    #         expansion=2 so Fi != F.
    _run_case(seed=0, B=2, L=20, F=16, n_states=4, expansion=2)
    print("KERNEL_OK")
</pallas_src>

<mosaic_0001>
module attributes {stable_mosaic.version = 11 : i64} {
  func.func @ssm_block_kernel(%arg0: i32, %arg1: memref<1x8x16xf32, #tpu.memory_space<vmem>>, %arg2: memref<16x16xbf16, #tpu.memory_space<vmem>>, %arg3: memref<1x16xf32, #tpu.memory_space<vmem>>, %arg4: memref<16x16xbf16, #tpu.memory_space<vmem>>, %arg5: memref<16x16xbf16, #tpu.memory_space<vmem>>, %arg6: memref<16x16xbf16, #tpu.memory_space<vmem>>, %arg7: memref<1x16xf32, #tpu.memory_space<vmem>>, %arg8: memref<4x16xf32, #tpu.memory_space<vmem>>, %arg9: memref<1x16xf32, #tpu.memory_space<vmem>>, %arg10: memref<16x9xbf16, #tpu.memory_space<vmem>>, %arg11: memref<1x9xf32, #tpu.memory_space<vmem>>, %arg12: memref<1x16xbf16, #tpu.memory_space<vmem>>, %arg13: memref<1x16xf32, #tpu.memory_space<vmem>>, %arg14: memref<16x16xbf16, #tpu.memory_space<vmem>>, %arg15: memref<1x16xf32, #tpu.memory_space<vmem>>, %arg16: memref<1x8x16xf32, #tpu.memory_space<vmem>>, %arg17: memref<8x16xf32, #tpu.memory_space<vmem>>, %arg18: memref<8x16xf32, #tpu.memory_space<vmem>>, %arg19: memref<8x4xf32, #tpu.memory_space<vmem>>, %arg20: memref<8x4xf32, #tpu.memory_space<vmem>>, %arg21: memref<8x16xf32, #tpu.memory_space<vmem>>) attributes {dimension_semantics = [#tpu.dimension_semantics<parallel>], iteration_bounds = array<i64: 2>, scalar_prefetch = 0 : i64, scratch_operands = 5 : i64, tpu.core_type = #tpu.core_type<tc>, window_params = [{transform_indices = @transform_0, window_bounds = array<i64: 1, 8, 16>}, {pipeline_mode = #tpu.pipeline_mode<synchronous>, transform_indices = @transform_1, window_bounds = array<i64: 16, 16>}, {pipeline_mode = #tpu.pipeline_mode<synchronous>, transform_indices = @transform_2, window_bounds = array<i64: 1, 16>}, {pipeline_mode = #tpu.pipeline_mode<synchronous>, transform_indices = @transform_3, window_bounds = array<i64: 16, 16>}, {pipeline_mode = #tpu.pipeline_mode<synchronous>, transform_indices = @transform_4, window_bounds = array<i64: 16, 16>}, {pipeline_mode = #tpu.pipeline_mode<synchronous>, transform_indices = @transform_5, window_bounds = array<i64: 16, 16>}, {pipeline_mode = #tpu.pipeline_mode<synchronous>, transform_indices = @transform_6, window_bounds = array<i64: 1, 16>}, {pipeline_mode = #tpu.pipeline_mode<synchronous>, transform_indices = @transform_7, window_bounds = array<i64: 4, 16>}, {pipeline_mode = #tpu.pipeline_mode<synchronous>, transform_indices = @transform_8, window_bounds = array<i64: 1, 16>}, {pipeline_mode = #tpu.pipeline_mode<synchronous>, transform_indices = @transform_9, window_bounds = array<i64: 16, 9>}, {pipeline_mode = #tpu.pipeline_mode<synchronous>, transform_indices = @transform_10, window_bounds = array<i64: 1, 9>}, {pipeline_mode = #tpu.pipeline_mode<synchronous>, transform_indices = @transform_11, window_bounds = array<i64: 1, 16>}, {pipeline_mode = #tpu.pipeline_mode<synchronous>, transform_indices = @transform_12, window_bounds = array<i64: 1, 16>}, {pipeline_mode = #tpu.pipeline_mode<synchronous>, transform_indices = @transform_13, window_bounds = array<i64: 16, 16>}, {pipeline_mode = #tpu.pipeline_mode<synchronous>, transform_indices = @transform_14, window_bounds = array<i64: 1, 16>}, {transform_indices = @transform_15, window_bounds = array<i64: 1, 8, 16>}]} {
    %c0 = arith.constant 0 : index
    %c0_0 = arith.constant 0 : index
    %c0_1 = arith.constant 0 : index
    %0 = vector.load %arg1[%c0, %c0_0, %c0_1] : memref<1x8x16xf32, #tpu.memory_space<vmem>>, vector<1x8x16xf32>
    %1 = vector.shape_cast %0 : vector<1x8x16xf32> to vector<8x16xf32>
    %2 = vector.shape_cast %1 : vector<8x16xf32> to vector<1x8x16xf32>
    %cst = arith.constant dense<0.000000e+00> : vector<1xf32>
    %3 = vector.multi_reduction <add>, %2, %cst [1, 2] : vector<1x8x16xf32> to vector<1xf32>
    %4 = vector.shape_cast %3 : vector<1xf32> to vector<1x1x1xf32>
    %5 = vector.extract %4[0, 0, 0] : f32 from vector<1x1x1xf32>
    %cst_2 = arith.constant 1.280000e+02 : f32
    %6 = arith.divf %5, %cst_2 : f32
    %7 = vector.broadcast %6 : f32 to vector<8x16xf32>
    %8 = arith.subf %1, %7 : vector<8x16xf32>
    %9 = arith.mulf %8, %8 : vector<8x16xf32>
    %10 = vector.shape_cast %9 : vector<8x16xf32> to vector<1x8x16xf32>
    %cst_3 = arith.constant dense<0.000000e+00> : vector<1xf32>
    %11 = vector.multi_reduction <add>, %10, %cst_3 [1, 2] : vector<1x8x16xf32> to vector<1xf32>
    %12 = vector.shape_cast %11 : vector<1xf32> to vector<1x1x1xf32>
    %13 = vector.extract %12[0, 0, 0] : f32 from vector<1x1x1xf32>
    %cst_4 = arith.constant 1.280000e+02 : f32
    %14 = arith.divf %13, %cst_4 : f32
    %15 = vector.broadcast %6 : f32 to vector<8x16xf32>
    %16 = arith.subf %1, %15 : vector<8x16xf32>
    %cst_5 = arith.constant 9.99999974E-6 : f32
    %17 = arith.addf %14, %cst_5 : f32
    %18 = math.rsqrt %17 : f32
    %19 = vector.broadcast %18 : f32 to vector<8x16xf32>
    %20 = arith.mulf %16, %19 : vector<8x16xf32>
    %21 = arith.truncf %20 : vector<8x16xf32> to vector<8x16xbf16>
    %c0_6 = arith.constant 0 : index
    %c0_7 = arith.constant 0 : index
    %22 = vector.load %arg2[%c0_6, %c0_7] : memref<16x16xbf16, #tpu.memory_space<vmem>>, vector<16x16xbf16>
    %cst_8 = arith.constant dense<0.000000e+00> : vector<8x16xf32>
    %23 = tpu.matmul %21, %22, %cst_8 {dimension_numbers = #tpu.dot_dimension_numbers<[1], [0], [0], [1], [0, 0, 1, 1], [], []>} : vector<8x16xbf16>, vector<16x16xbf16>, vector<8x16xf32> -> vector<8x16xf32>
    %c0_9 = arith.constant 0 : index
    %c0_10 = arith.constant 0 : index
    %24 = vector.load %arg3[%c0_9, %c0_10] : memref<1x16xf32, #tpu.memory_space<vmem>>, vector<1x16xf32>
    %25 = vector.broadcast %24 : vector<1x16xf32> to vector<8x16xf32>
    %26 = arith.addf %23, %25 : vector<8x16xf32>
    %27 = tpu.iota {dimensions = array<i32: 0>} : vector<8x1xi32>
    %c0_i32 = arith.constant 0 : i32
    %28 = vector.broadcast %c0_i32 : i32 to vector<8x1xi32>
    %29 = arith.cmpi eq, %27, %28 : vector<8x1xi32>
    %c1_i32 = arith.constant 1 : i32
    %30 = tpu.dynamic_rotate %26 by %c1_i32 dim 0 : vector<8x16xf32>, i32 -> vector<8x16xf32>
    %cst_11 = arith.constant 0.000000e+00 : f32
    %31 = vector.shape_cast %29 : vector<8x1xi1> to vector<8x1xi1>
    %32 = vector.broadcast %31 : vector<8x1xi1> to vector<8x16xi1>
    %33 = vector.broadcast %cst_11 : f32 to vector<8x16xf32>
    %34 = arith.select %32, %33, %30 : vector<8x16xi1>, vector<8x16xf32>
    %c7_i32 = arith.constant 7 : i32
    %35 = vector.broadcast %c7_i32 : i32 to vector<8x1xi32>
    %36 = arith.cmpi eq, %27, %35 : vector<8x1xi32>
    %c7_i32_12 = arith.constant 7 : i32
    %37 = tpu.dynamic_rotate %26 by %c7_i32_12 dim 0 : vector<8x16xf32>, i32 -> vector<8x16xf32>
    %cst_13 = arith.constant 0.000000e+00 : f32
    %38 = vector.shape_cast %36 : vector<8x1xi1> to vector<8x1xi1>
    %39 = vector.broadcast %38 : vector<8x1xi1> to vector<8x16xi1>
    %40 = vector.broadcast %cst_13 : f32 to vector<8x16xf32>
    %41 = arith.select %39, %40, %37 : vector<8x16xi1>, vector<8x16xf32>
    %42 = arith.truncf %34 : vector<8x16xf32> to vector<8x16xbf16>
    %c0_14 = arith.constant 0 : index
    %c0_15 = arith.constant 0 : index
    %43 = vector.load %arg4[%c0_14, %c0_15] : memref<16x16xbf16, #tpu.memory_space<vmem>>, vector<16x16xbf16>
    %cst_16 = arith.constant dense<0.000000e+00> : vector<8x16xf32>
    %44 = tpu.matmul %42, %43, %cst_16 {dimension_numbers = #tpu.dot_dimension_numbers<[1], [0], [0], [1], [0, 0, 1, 1], [], []>} : vector<8x16xbf16>, vector<16x16xbf16>, vector<8x16xf32> -> vector<8x16xf32>
    %45 = arith.truncf %26 : vector<8x16xf32> to vector<8x16xbf16>
    %c0_17 = arith.constant 0 : index
    %c0_18 = arith.constant 0 : index
    %46 = vector.load %arg5[%c0_17, %c0_18] : memref<16x16xbf16, #tpu.memory_space<vmem>>, vector<16x16xbf16>
    %cst_19 = arith.constant dense<0.000000e+00> : vector<8x16xf32>
    %47 = tpu.matmul %45, %46, %cst_19 {dimension_numbers = #tpu.dot_dimension_numbers<[1], [0], [0], [1], [0, 0, 1, 1], [], []>} : vector<8x16xbf16>, vector<16x16xbf16>, vector<8x16xf32> -> vector<8x16xf32>
    %48 = arith.addf %44, %47 : vector<8x16xf32>
    %49 = arith.truncf %41 : vector<8x16xf32> to vector<8x16xbf16>
    %c0_20 = arith.constant 0 : index
    %c0_21 = arith.constant 0 : index
    %50 = vector.load %arg6[%c0_20, %c0_21] : memref<16x16xbf16, #tpu.memory_space<vmem>>, vector<16x16xbf16>
    %cst_22 = arith.constant dense<0.000000e+00> : vector<8x16xf32>
    %51 = tpu.matmul %49, %50, %cst_22 {dimension_numbers = #tpu.dot_dimension_numbers<[1], [0], [0], [1], [0, 0, 1, 1], [], []>} : vector<8x16xbf16>, vector<16x16xbf16>, vector<8x16xf32> -> vector<8x16xf32>
    %52 = arith.addf %48, %51 : vector<8x16xf32>
    %c0_23 = arith.constant 0 : index
    %c0_24 = arith.constant 0 : index
    %53 = vector.load %arg7[%c0_23, %c0_24] : memref<1x16xf32, #tpu.memory_space<vmem>>, vector<1x16xf32>
    %54 = vector.broadcast %53 : vector<1x16xf32> to vector<8x16xf32>
    %55 = arith.addf %52, %54 : vector<8x16xf32>
    %cst_25 = arith.constant dense<0.000000e+00> : vector<16xf32>
    %56 = vector.multi_reduction <add>, %55, %cst_25 [0] : vector<8x16xf32> to vector<16xf32>
    %57 = vector.shape_cast %56 : vector<16xf32> to vector<1x16xf32>
    %cst_26 = arith.constant 8.000000e+00 : f32
    %58 = vector.broadcast %cst_26 : f32 to vector<1x16xf32>
    %59 = arith.divf %57, %58 : vector<1x16xf32>
    %60 = vector.broadcast %59 : vector<1x16xf32> to vector<8x16xf32>
    %61 = arith.subf %55, %60 : vector<8x16xf32>
    %62 = arith.mulf %61, %61 : vector<8x16xf32>
    %cst_27 = arith.constant dense<0.000000e+00> : vector<16xf32>
    %63 = vector.multi_reduction <add>, %62, %cst_27 [0] : vector<8x16xf32> to vector<16xf32>
    %64 = vector.shape_cast %63 : vector<16xf32> to vector<1x16xf32>
    %cst_28 = arith.constant 8.000000e+00 : f32
    %65 = vector.broadcast %cst_28 : f32 to vector<1x16xf32>
    %66 = arith.divf %64, %65 : vector<1x16xf32>
    %67 = vector.broadcast %59 : vector<1x16xf32> to vector<8x16xf32>
    %68 = arith.subf %55, %67 : vector<8x16xf32>
    %cst_29 = arith.constant 9.99999974E-6 : f32
    %69 = vector.broadcast %cst_29 : f32 to vector<1x16xf32>
    %70 = arith.addf %66, %69 : vector<1x16xf32>
    %71 = math.rsqrt %70 : vector<1x16xf32>
    %72 = vector.broadcast %71 : vector<1x16xf32> to vector<8x16xf32>
    %73 = arith.mulf %68, %72 : vector<8x16xf32>
    %cst_30 = arith.constant 0.000000e+00 : f32
    %74 = vector.broadcast %cst_30 : f32 to vector<8x16xf32>
    %75 = arith.subf %74, %73 : vector<8x16xf32>
    %76 = math.exp %75 : vector<8x16xf32>
    %cst_31 = arith.constant 1.000000e+00 : f32
    %77 = vector.broadcast %cst_31 : f32 to vector<8x16xf32>
    %78 = arith.addf %77, %76 : vector<8x16xf32>
    %cst_32 = arith.constant 1.000000e+00 : f32
    %79 = vector.broadcast %cst_32 : f32 to vector<8x16xf32>
    %80 = arith.divf %79, %78 : vector<8x16xf32>
    %81 = arith.mulf %73, %80 : vector<8x16xf32>
    %82 = arith.truncf %81 : vector<8x16xf32> to vector<8x16xbf16>
    %c0_33 = arith.constant 0 : index
    %c0_34 = arith.constant 0 : index
    %83 = vector.load %arg10[%c0_33, %c0_34] : memref<16x9xbf16, #tpu.memory_space<vmem>>, vector<16x9xbf16>
    %cst_35 = arith.constant dense<0.000000e+00> : vector<8x9xf32>
    %84 = tpu.matmul %82, %83, %cst_35 {dimension_numbers = #tpu.dot_dimension_numbers<[1], [0], [0], [1], [0, 0, 1, 1], [], []>} : vector<8x16xbf16>, vector<16x9xbf16>, vector<8x9xf32> -> vector<8x9xf32>
    %c0_36 = arith.constant 0 : index
    %c0_37 = arith.constant 0 : index
    %85 = vector.load %arg11[%c0_36, %c0_37] : memref<1x9xf32, #tpu.memory_space<vmem>>, vector<1x9xf32>
    %86 = vector.broadcast %85 : vector<1x9xf32> to vector<8x9xf32>
    %87 = arith.addf %84, %86 : vector<8x9xf32>
    %88 = vector.extract_strided_slice %87 {offsets = [0, 0], sizes = [8, 4], strides = [1, 1]} : vector<8x9xf32> to vector<8x4xf32>
    %89 = vector.extract_strided_slice %87 {offsets = [0, 4], sizes = [8, 4], strides = [1, 1]} : vector<8x9xf32> to vector<8x4xf32>
    %90 = vector.extract_strided_slice %87 {offsets = [0, 8], sizes = [8, 1], strides = [1, 1]} : vector<8x9xf32> to vector<8x1xf32>
    %91 = arith.truncf %90 : vector<8x1xf32> to vector<8x1xbf16>
    %c0_38 = arith.constant 0 : index
    %c0_39 = arith.constant 0 : index
    %92 = vector.load %arg12[%c0_38, %c0_39] : memref<1x16xbf16, #tpu.memory_space<vmem>>, vector<1x16xbf16>
    %cst_40 = arith.constant dense<0.000000e+00> : vector<8x16xf32>
    %93 = tpu.matmul %91, %92, %cst_40 {dimension_numbers = #tpu.dot_dimension_numbers<[1], [0], [0], [1], [0, 0, 1, 1], [], []>} : vector<8x1xbf16>, vector<1x16xbf16>, vector<8x16xf32> -> vector<8x16xf32>
    %c0_41 = arith.constant 0 : index
    %c0_42 = arith.constant 0 : index
    %94 = vector.load %arg13[%c0_41, %c0_42] : memref<1x16xf32, #tpu.memory_space<vmem>>, vector<1x16xf32>
    %95 = vector.broadcast %94 : vector<1x16xf32> to vector<8x16xf32>
    %96 = arith.addf %93, %95 : vector<8x16xf32>
    %cst_43 = arith.constant 2.000000e+01 : f32
    %97 = vector.broadcast %cst_43 : f32 to vector<8x16xf32>
    %98 = arith.cmpf ogt, %96, %97 : vector<8x16xf32>
    %cst_44 = arith.constant 2.000000e+01 : f32
    %99 = vector.broadcast %cst_44 : f32 to vector<8x16xf32>
    %100 = arith.minimumf %96, %99 : vector<8x16xf32>
    %101 = math.exp %100 : vector<8x16xf32>
    %102 = math.log1p %101 : vector<8x16xf32>
    %103 = arith.select %98, %96, %102 : vector<8x16xi1>, vector<8x16xf32>
    %c0_45 = arith.constant 0 : index
    %c0_46 = arith.constant 0 : index
    %104 = vector.load %arg17[%c0_45, %c0_46] : memref<8x16xf32, #tpu.memory_space<vmem>>, vector<8x16xf32>
    tpu.vector_store %arg17[%c0_45, %c0_46], %103 {strides = array<i32>} : memref<8x16xf32, #tpu.memory_space<vmem>>, vector<8x16xf32>,
    %105 = arith.mulf %103, %81 : vector<8x16xf32>
    %c0_47 = arith.constant 0 : index
    %c0_48 = arith.constant 0 : index
    %106 = vector.load %arg18[%c0_47, %c0_48] : memref<8x16xf32, #tpu.memory_space<vmem>>, vector<8x16xf32>
    tpu.vector_store %arg18[%c0_47, %c0_48], %105 {strides = array<i32>} : memref<8x16xf32, #tpu.memory_space<vmem>>, vector<8x16xf32>,
    %c0_49 = arith.constant 0 : index
    %c0_50 = arith.constant 0 : index
    %107 = vector.load %arg19[%c0_49, %c0_50] : memref<8x4xf32, #tpu.memory_space<vmem>>, vector<8x4xf32>
    tpu.vector_store %arg19[%c0_49, %c0_50], %88 {strides = array<i32>} : memref<8x4xf32, #tpu.memory_space<vmem>>, vector<8x4xf32>,
    %c0_51 = arith.constant 0 : index
    %c0_52 = arith.constant 0 : index
    %108 = vector.load %arg20[%c0_51, %c0_52] : memref<8x4xf32, #tpu.memory_space<vmem>>, vector<8x4xf32>
    tpu.vector_store %arg20[%c0_51, %c0_52], %89 {strides = array<i32>} : memref<8x4xf32, #tpu.memory_space<vmem>>, vector<8x4xf32>,
    %c0_53 = arith.constant 0 : index
    %c0_54 = arith.constant 0 : index
    %109 = vector.load %arg8[%c0_53, %c0_54] : memref<4x16xf32, #tpu.memory_space<vmem>>, vector<4x16xf32>
    %cst_55 = arith.constant 0.000000e+00 : f32
    %110 = vector.broadcast %cst_55 : f32 to vector<4x16xf32>
    %c0_i32_56 = arith.constant 0 : i32
    %c8_i32 = arith.constant 8 : i32
    %111 = arith.muli %c0_i32_56, %c8_i32 : i32
    %112 = tpu.assume_multiple %111, 8 : i32
    %113 = arith.index_cast %112 : i32 to index
    %c0_57 = arith.constant 0 : index
    %114 = vector.load %arg17[%113, %c0_57] : memref<8x16xf32, #tpu.memory_space<vmem>>, vector<8x16xf32>
    %115 = arith.index_cast %112 : i32 to index
    %c0_58 = arith.constant 0 : index
    %116 = vector.load %arg18[%115, %c0_58] : memref<8x16xf32, #tpu.memory_space<vmem>>, vector<8x16xf32>
    %117 = arith.index_cast %112 : i32 to index
    %c0_59 = arith.constant 0 : index
    %118 = vector.load %arg19[%117, %c0_59] : memref<8x4xf32, #tpu.memory_space<vmem>>, vector<8x4xf32>
    %119 = arith.index_cast %112 : i32 to index
    %c0_60 = arith.constant 0 : index
    %120 = vector.load %arg20[%119, %c0_60] : memref<8x4xf32, #tpu.memory_space<vmem>>, vector<8x4xf32>
    %121 = vector.extract_strided_slice %114 {offsets = [0, 0], sizes = [1, 16], strides = [1, 1]} : vector<8x16xf32> to vector<1x16xf32>
    %122 = vector.shape_cast %121 : vector<1x16xf32> to vector<16xf32>
    %123 = vector.shape_cast %122 : vector<16xf32> to vector<1x16xf32>
    %cst_61 = arith.constant 0.000000e+00 : f32
    %124 = vector.broadcast %cst_61 : f32 to vector<1x16xf32>
    %125 = arith.subf %124, %123 : vector<1x16xf32>
    %126 = vector.broadcast %125 : vector<1x16xf32> to vector<4x16xf32>
    %127 = arith.mulf %126, %109 : vector<4x16xf32>
    %128 = math.exp %127 : vector<4x16xf32>
    %129 = arith.mulf %128, %110 : vector<4x16xf32>
    %130 = vector.extract_strided_slice %116 {offsets = [0, 0], sizes = [1, 16], strides = [1, 1]} : vector<8x16xf32> to vector<1x16xf32>
    %131 = vector.shape_cast %130 : vector<1x16xf32> to vector<16xf32>
    %132 = vector.shape_cast %131 : vector<16xf32> to vector<1x16xf32>
    %133 = vector.extract_strided_slice %118 {offsets = [0, 0], sizes = [1, 4], strides = [1, 1]} : vector<8x4xf32> to vector<1x4xf32>
    %134 = vector.shape_cast %133 : vector<1x4xf32> to vector<4xf32>
    %135 = vector.shape_cast %134 : vector<4xf32> to vector<4x1xf32>
    %136 = vector.broadcast %132 : vector<1x16xf32> to vector<4x16xf32>
    %137 = vector.broadcast %135 : vector<4x1xf32> to vector<4x16xf32>
    %138 = arith.mulf %136, %137 : vector<4x16xf32>
    %139 = arith.addf %129, %138 : vector<4x16xf32>
    %140 = vector.extract_strided_slice %120 {offsets = [0, 0], sizes = [1, 4], strides = [1, 1]} : vector<8x4xf32> to vector<1x4xf32>
    %141 = vector.shape_cast %140 : vector<1x4xf32> to vector<4xf32>
    %142 = vector.shape_cast %141 : vector<4xf32> to vector<4x1xf32>
    %143 = vector.broadcast %142 : vector<4x1xf32> to vector<4x16xf32>
    %144 = arith.mulf %139, %143 : vector<4x16xf32>
    %cst_62 = arith.constant dense<0.000000e+00> : vector<16xf32>
    %145 = vector.multi_reduction <add>, %144, %cst_62 [0] : vector<4x16xf32> to vector<16xf32>
    %146 = vector.shape_cast %145 : vector<16xf32> to vector<1x16xf32>
    %147 = vector.extract_strided_slice %114 {offsets = [1, 0], sizes = [1, 16], strides = [1, 1]} : vector<8x16xf32> to vector<1x16xf32>
    %148 = vector.shape_cast %147 : vector<1x16xf32> to vector<16xf32>
    %149 = vector.shape_cast %148 : vector<16xf32> to vector<1x16xf32>
    %cst_63 = arith.constant 0.000000e+00 : f32
    %150 = vector.broadcast %cst_63 : f32 to vector<1x16xf32>
    %151 = arith.subf %150, %149 : vector<1x16xf32>
    %152 = vector.broadcast %151 : vector<1x16xf32> to vector<4x16xf32>
    %153 = arith.mulf %152, %109 : vector<4x16xf32>
    %154 = math.exp %153 : vector<4x16xf32>
    %155 = arith.mulf %154, %139 : vector<4x16xf32>
    %156 = vector.extract_strided_slice %116 {offsets = [1, 0], sizes = [1, 16], strides = [1, 1]} : vector<8x16xf32> to vector<1x16xf32>
    %157 = vector.shape_cast %156 : vector<1x16xf32> to vector<16xf32>
    %158 = vector.shape_cast %157 : vector<16xf32> to vector<1x16xf32>
    %159 = vector.extract_strided_slice %118 {offsets = [1, 0], sizes = [1, 4], strides = [1, 1]} : vector<8x4xf32> to vector<1x4xf32>
    %160 = vector.shape_cast %159 : vector<1x4xf32> to vector<4xf32>
    %161 = vector.shape_cast %160 : vector<4xf32> to vector<4x1xf32>
    %162 = vector.broadcast %158 : vector<1x16xf32> to vector<4x16xf32>
    %163 = vector.broadcast %161 : vector<4x1xf32> to vector<4x16xf32>
    %164 = arith.mulf %162, %163 : vector<4x16xf32>
    %165 = arith.addf %155, %164 : vector<4x16xf32>
    %166 = vector.extract_strided_slice %120 {offsets = [1, 0], sizes = [1, 4], strides = [1, 1]} : vector<8x4xf32> to vector<1x4xf32>
    %167 = vector.shape_cast %166 : vector<1x4xf32> to vector<4xf32>
    %168 = vector.shape_cast %167 : vector<4xf32> to vector<4x1xf32>
    %169 = vector.broadcast %168 : vector<4x1xf32> to vector<4x16xf32>
    %170 = arith.mulf %165, %169 : vector<4x16xf32>
    %cst_64 = arith.constant dense<0.000000e+00> : vector<16xf32>
    %171 = vector.multi_reduction <add>, %170, %cst_64 [0] : vector<4x16xf32> to vector<16xf32>
    %172 = vector.shape_cast %171 : vector<16xf32> to vector<1x16xf32>
    %173 = vector.extract_strided_slice %114 {offsets = [2, 0], sizes = [1, 16], strides = [1, 1]} : vector<8x16xf32> to vector<1x16xf32>
    %174 = vector.shape_cast %173 : vector<1x16xf32> to vector<16xf32>
    %175 = vector.shape_cast %174 : vector<16xf32> to vector<1x16xf32>
    %cst_65 = arith.constant 0.000000e+00 : f32
    %176 = vector.broadcast %cst_65 : f32 to vector<1x16xf32>
    %177 = arith.subf %176, %175 : vector<1x16xf32>
    %178 = vector.broadcast %177 : vector<1x16xf32> to vector<4x16xf32>
    %179 = arith.mulf %178, %109 : vector<4x16xf32>
    %180 = math.exp %179 : vector<4x16xf32>
    %181 = arith.mulf %180, %165 : vector<4x16xf32>
    %182 = vector.extract_strided_slice %116 {offsets = [2, 0], sizes = [1, 16], strides = [1, 1]} : vector<8x16xf32> to vector<1x16xf32>
    %183 = vector.shape_cast %182 : vector<1x16xf32> to vector<16xf32>
    %184 = vector.shape_cast %183 : vector<16xf32> to vector<1x16xf32>
    %185 = vector.extract_strided_slice %118 {offsets = [2, 0], sizes = [1, 4], strides = [1, 1]} : vector<8x4xf32> to vector<1x4xf32>
    %186 = vector.shape_cast %185 : vector<1x4xf32> to vector<4xf32>
    %187 = vector.shape_cast %186 : vector<4xf32> to vector<4x1xf32>
    %188 = vector.broadcast %184 : vector<1x16xf32> to vector<4x16xf32>
    %189 = vector.broadcast %187 : vector<4x1xf32> to vector<4x16xf32>
    %190 = arith.mulf %188, %189 : vector<4x16xf32>
    %191 = arith.addf %181, %190 : vector<4x16xf32>
    %192 = vector.extract_strided_slice %120 {offsets = [2, 0], sizes = [1, 4], strides = [1, 1]} : vector<8x4xf32> to vector<1x4xf32>
    %193 = vector.shape_cast %192 : vector<1x4xf32> to vector<4xf32>
    %194 = vector.shape_cast %193 : vector<4xf32> to vector<4x1xf32>
    %195 = vector.broadcast %194 : vector<4x1xf32> to vector<4x16xf32>
    %196 = arith.mulf %191, %195 : vector<4x16xf32>
    %cst_66 = arith.constant dense<0.000000e+00> : vector<16xf32>
    %197 = vector.multi_reduction <add>, %196, %cst_66 [0] : vector<4x16xf32> to vector<16xf32>
    %198 = vector.shape_cast %197 : vector<16xf32> to vector<1x16xf32>
    %199 = vector.extract_strided_slice %114 {offsets = [3, 0], sizes = [1, 16], strides = [1, 1]} : vector<8x16xf32> to vector<1x16xf32>
    %200 = vector.shape_cast %199 : vector<1x16xf32> to vector<16xf32>
    %201 = vector.shape_cast %200 : vector<16xf32> to vector<1x16xf32>
    %cst_67 = arith.constant 0.000000e+00 : f32
    %202 = vector.broadcast %cst_67 : f32 to vector<1x16xf32>
    %203 = arith.subf %202, %201 : vector<1x16xf32>
    %204 = vector.broadcast %203 : vector<1x16xf32> to vector<4x16xf32>
    %205 = arith.mulf %204, %109 : vector<4x16xf32>
    %206 = math.exp %205 : vector<4x16xf32>
    %207 = arith.mulf %206, %191 : vector<4x16xf32>
    %208 = vector.extract_strided_slice %116 {offsets = [3, 0], sizes = [1, 16], strides = [1, 1]} : vector<8x16xf32> to vector<1x16xf32>
    %209 = vector.shape_cast %208 : vector<1x16xf32> to vector<16xf32>
    %210 = vector.shape_cast %209 : vector<16xf32> to vector<1x16xf32>
    %211 = vector.extract_strided_slice %118 {offsets = [3, 0], sizes = [1, 4], strides = [1, 1]} : vector<8x4xf32> to vector<1x4xf32>
    %212 = vector.shape_cast %211 : vector<1x4xf32> to vector<4xf32>
    %213 = vector.shape_cast %212 : vector<4xf32> to vector<4x1xf32>
    %214 = vector.broadcast %210 : vector<1x16xf32> to vector<4x16xf32>
    %215 = vector.broadcast %213 : vector<4x1xf32> to vector<4x16xf32>
    %216 = arith.mulf %214, %215 : vector<4x16xf32>
    %217 = arith.addf %207, %216 : vector<4x16xf32>
    %218 = vector.extract_strided_slice %120 {offsets = [3, 0], sizes = [1, 4], strides = [1, 1]} : vector<8x4xf32> to vector<1x4xf32>
    %219 = vector.shape_cast %218 : vector<1x4xf32> to vector<4xf32>
    %220 = vector.shape_cast %219 : vector<4xf32> to vector<4x1xf32>
    %221 = vector.broadcast %220 : vector<4x1xf32> to vector<4x16xf32>
    %222 = arith.mulf %217, %221 : vector<4x16xf32>
    %cst_68 = arith.constant dense<0.000000e+00> : vector<16xf32>
    %223 = vector.multi_reduction <add>, %222, %cst_68 [0] : vector<4x16xf32> to vector<16xf32>
    %224 = vector.shape_cast %223 : vector<16xf32> to vector<1x16xf32>
    %225 = vector.extract_strided_slice %114 {offsets = [4, 0], sizes = [1, 16], strides = [1, 1]} : vector<8x16xf32> to vector<1x16xf32>
    %226 = vector.shape_cast %225 : vector<1x16xf32> to vector<16xf32>
    %227 = vector.shape_cast %226 : vector<16xf32> to vector<1x16xf32>
    %cst_69 = arith.constant 0.000000e+00 : f32
    %228 = vector.broadcast %cst_69 : f32 to vector<1x16xf32>
    %229 = arith.subf %228, %227 : vector<1x16xf32>
    %230 = vector.broadcast %229 : vector<1x16xf32> to vector<4x16xf32>
    %231 = arith.mulf %230, %109 : vector<4x16xf32>
    %232 = math.exp %231 : vector<4x16xf32>
    %233 = arith.mulf %232, %217 : vector<4x16xf32>
    %234 = vector.extract_strided_slice %116 {offsets = [4, 0], sizes = [1, 16], strides = [1, 1]} : vector<8x16xf32> to vector<1x16xf32>
    %235 = vector.shape_cast %234 : vector<1x16xf32> to vector<16xf32>
    %236 = vector.shape_cast %235 : vector<16xf32> to vector<1x16xf32>
    %237 = vector.extract_strided_slice %118 {offsets = [4, 0], sizes = [1, 4], strides = [1, 1]} : vector<8x4xf32> to vector<1x4xf32>
    %238 = vector.shape_cast %237 : vector<1x4xf32> to vector<4xf32>
    %239 = vector.shape_cast %238 : vector<4xf32> to vector<4x1xf32>
    %240 = vector.broadcast %236 : vector<1x16xf32> to vector<4x16xf32>
    %241 = vector.broadcast %239 : vector<4x1xf32> to vector<4x16xf32>
    %242 = arith.mulf %240, %241 : vector<4x16xf32>
    %243 = arith.addf %233, %242 : vector<4x16xf32>
    %244 = vector.extract_strided_slice %120 {offsets = [4, 0], sizes = [1, 4], strides = [1, 1]} : vector<8x4xf32> to vector<1x4xf32>
    %245 = vector.shape_cast %244 : vector<1x4xf32> to vector<4xf32>
    %246 = vector.shape_cast %245 : vector<4xf32> to vector<4x1xf32>
    %247 = vector.broadcast %246 : vector<4x1xf32> to vector<4x16xf32>
    %248 = arith.mulf %243, %247 : vector<4x16xf32>
    %cst_70 = arith.constant dense<0.000000e+00> : vector<16xf32>
    %249 = vector.multi_reduction <add>, %248, %cst_70 [0] : vector<4x16xf32> to vector<16xf32>
    %250 = vector.shape_cast %249 : vector<16xf32> to vector<1x16xf32>
    %251 = vector.extract_strided_slice %114 {offsets = [5, 0], sizes = [1, 16], strides = [1, 1]} : vector<8x16xf32> to vector<1x16xf32>
    %252 = vector.shape_cast %251 : vector<1x16xf32> to vector<16xf32>
    %253 = vector.shape_cast %252 : vector<16xf32> to vector<1x16xf32>
    %cst_71 = arith.constant 0.000000e+00 : f32
    %254 = vector.broadcast %cst_71 : f32 to vector<1x16xf32>
    %255 = arith.subf %254, %253 : vector<1x16xf32>
    %256 = vector.broadcast %255 : vector<1x16xf32> to vector<4x16xf32>
    %257 = arith.mulf %256, %109 : vector<4x16xf32>
    %258 = math.exp %257 : vector<4x16xf32>
    %259 = arith.mulf %258, %243 : vector<4x16xf32>
    %260 = vector.extract_strided_slice %116 {offsets = [5, 0], sizes = [1, 16], strides = [1, 1]} : vector<8x16xf32> to vector<1x16xf32>
    %261 = vector.shape_cast %260 : vector<1x16xf32> to vector<16xf32>
    %262 = vector.shape_cast %261 : vector<16xf32> to vector<1x16xf32>
    %263 = vector.extract_strided_slice %118 {offsets = [5, 0], sizes = [1, 4], strides = [1, 1]} : vector<8x4xf32> to vector<1x4xf32>
    %264 = vector.shape_cast %263 : vector<1x4xf32> to vector<4xf32>
    %265 = vector.shape_cast %264 : vector<4xf32> to vector<4x1xf32>
    %266 = vector.broadcast %262 : vector<1x16xf32> to vector<4x16xf32>
    %267 = vector.broadcast %265 : vector<4x1xf32> to vector<4x16xf32>
    %268 = arith.mulf %266, %267 : vector<4x16xf32>
    %269 = arith.addf %259, %268 : vector<4x16xf32>
    %270 = vector.extract_strided_slice %120 {offsets = [5, 0], sizes = [1, 4], strides = [1, 1]} : vector<8x4xf32> to vector<1x4xf32>
    %271 = vector.shape_cast %270 : vector<1x4xf32> to vector<4xf32>
    %272 = vector.shape_cast %271 : vector<4xf32> to vector<4x1xf32>
    %273 = vector.broadcast %272 : vector<4x1xf32> to vector<4x16xf32>
    %274 = arith.mulf %269, %273 : vector<4x16xf32>
    %cst_72 = arith.constant dense<0.000000e+00> : vector<16xf32>
    %275 = vector.multi_reduction <add>, %274, %cst_72 [0] : vector<4x16xf32> to vector<16xf32>
    %276 = vector.shape_cast %275 : vector<16xf32> to vector<1x16xf32>
    %277 = vector.extract_strided_slice %114 {offsets = [6, 0], sizes = [1, 16], strides = [1, 1]} : vector<8x16xf32> to vector<1x16xf32>
    %278 = vector.shape_cast %277 : vector<1x16xf32> to vector<16xf32>
    %279 = vector.shape_cast %278 : vector<16xf32> to vector<1x16xf32>
    %cst_73 = arith.constant 0.000000e+00 : f32
    %280 = vector.broadcast %cst_73 : f32 to vector<1x16xf32>
    %281 = arith.subf %280, %279 : vector<1x16xf32>
    %282 = vector.broadcast %281 : vector<1x16xf32> to vector<4x16xf32>
    %283 = arith.mulf %282, %109 : vector<4x16xf32>
    %284 = math.exp %283 : vector<4x16xf32>
    %285 = arith.mulf %284, %269 : vector<4x16xf32>
    %286 = vector.extract_strided_slice %116 {offsets = [6, 0], sizes = [1, 16], strides = [1, 1]} : vector<8x16xf32> to vector<1x16xf32>
    %287 = vector.shape_cast %286 : vector<1x16xf32> to vector<16xf32>
    %288 = vector.shape_cast %287 : vector<16xf32> to vector<1x16xf32>
    %289 = vector.extract_strided_slice %118 {offsets = [6, 0], sizes = [1, 4], strides = [1, 1]} : vector<8x4xf32> to vector<1x4xf32>
    %290 = vector.shape_cast %289 : vector<1x4xf32> to vector<4xf32>
    %291 = vector.shape_cast %290 : vector<4xf32> to vector<4x1xf32>
    %292 = vector.broadcast %288 : vector<1x16xf32> to vector<4x16xf32>
    %293 = vector.broadcast %291 : vector<4x1xf32> to vector<4x16xf32>
    %294 = arith.mulf %292, %293 : vector<4x16xf32>
    %295 = arith.addf %285, %294 : vector<4x16xf32>
    %296 = vector.extract_strided_slice %120 {offsets = [6, 0], sizes = [1, 4], strides = [1, 1]} : vector<8x4xf32> to vector<1x4xf32>
    %297 = vector.shape_cast %296 : vector<1x4xf32> to vector<4xf32>
    %298 = vector.shape_cast %297 : vector<4xf32> to vector<4x1xf32>
    %299 = vector.broadcast %298 : vector<4x1xf32> to vector<4x16xf32>
    %300 = arith.mulf %295, %299 : vector<4x16xf32>
    %cst_74 = arith.constant dense<0.000000e+00> : vector<16xf32>
    %301 = vector.multi_reduction <add>, %300, %cst_74 [0] : vector<4x16xf32> to vector<16xf32>
    %302 = vector.shape_cast %301 : vector<16xf32> to vector<1x16xf32>
    %303 = vector.extract_strided_slice %114 {offsets = [7, 0], sizes = [1, 16], strides = [1, 1]} : vector<8x16xf32> to vector<1x16xf32>
    %304 = vector.shape_cast %303 : vector<1x16xf32> to vector<16xf32>
    %305 = vector.shape_cast %304 : vector<16xf32> to vector<1x16xf32>
    %cst_75 = arith.constant 0.000000e+00 : f32
    %306 = vector.broadcast %cst_75 : f32 to vector<1x16xf32>
    %307 = arith.subf %306, %305 : vector<1x16xf32>
    %308 = vector.broadcast %307 : vector<1x16xf32> to vector<4x16xf32>
    %309 = arith.mulf %308, %109 : vector<4x16xf32>
    %310 = math.exp %309 : vector<4x16xf32>
    %311 = arith.mulf %310, %295 : vector<4x16xf32>
    %312 = vector.extract_strided_slice %116 {offsets = [7, 0], sizes = [1, 16], strides = [1, 1]} : vector<8x16xf32> to vector<1x16xf32>
    %313 = vector.shape_cast %312 : vector<1x16xf32> to vector<16xf32>
    %314 = vector.shape_cast %313 : vector<16xf32> to vector<1x16xf32>
    %315 = vector.extract_strided_slice %118 {offsets = [7, 0], sizes = [1, 4], strides = [1, 1]} : vector<8x4xf32> to vector<1x4xf32>
    %316 = vector.shape_cast %315 : vector<1x4xf32> to vector<4xf32>
    %317 = vector.shape_cast %316 : vector<4xf32> to vector<4x1xf32>
    %318 = vector.broadcast %314 : vector<1x16xf32> to vector<4x16xf32>
    %319 = vector.broadcast %317 : vector<4x1xf32> to vector<4x16xf32>
    %320 = arith.mulf %318, %319 : vector<4x16xf32>
    %321 = arith.addf %311, %320 : vector<4x16xf32>
    %322 = vector.extract_strided_slice %120 {offsets = [7, 0], sizes = [1, 4], strides = [1, 1]} : vector<8x4xf32> to vector<1x4xf32>
    %323 = vector.shape_cast %322 : vector<1x4xf32> to vector<4xf32>
    %324 = vector.shape_cast %323 : vector<4xf32> to vector<4x1xf32>
    %325 = vector.broadcast %324 : vector<4x1xf32> to vector<4x16xf32>
    %326 = arith.mulf %321, %325 : vector<4x16xf32>
    %cst_76 = arith.constant dense<0.000000e+00> : vector<16xf32>
    %327 = vector.multi_reduction <add>, %326, %cst_76 [0] : vector<4x16xf32> to vector<16xf32>
    %328 = vector.shape_cast %327 : vector<16xf32> to vector<1x16xf32>
    %329 = tpu.concatenate %146, %172, %198, %224, %250, %276, %302, %328 in 0 : vector<1x16xf32>, vector<1x16xf32>, vector<1x16xf32>, vector<1x16xf32>, vector<1x16xf32>, vector<1x16xf32>, vector<1x16xf32>, vector<1x16xf32> -> vector<8x16xf32>
    %330 = arith.index_cast %112 : i32 to index
    %c0_77 = arith.constant 0 : index
    %331 = vector.load %arg21[%330, %c0_77] : memref<8x16xf32, #tpu.memory_space<vmem>>, vector<8x16xf32>
    tpu.vector_store %arg21[%330, %c0_77], %329 {strides = array<i32>} : memref<8x16xf32, #tpu.memory_space<vmem>>, vector<8x16xf32>,
    %c1_i32_78 = arith.constant 1 : i32
    %c0_79 = arith.constant 0 : index
    %c0_80 = arith.constant 0 : index
    %332 = vector.load %arg21[%c0_79, %c0_80] : memref<8x16xf32, #tpu.memory_space<vmem>>, vector<8x16xf32>
    %c0_81 = arith.constant 0 : index
    %c0_82 = arith.constant 0 : index
    %333 = vector.load %arg9[%c0_81, %c0_82] : memref<1x16xf32, #tpu.memory_space<vmem>>, vector<1x16xf32>
    %334 = vector.broadcast %333 : vector<1x16xf32> to vector<8x16xf32>
    %335 = arith.mulf %334, %81 : vector<8x16xf32>
    %336 = arith.addf %332, %335 : vector<8x16xf32>
    %cst_83 = arith.constant 0.000000e+00 : f32
    %337 = vector.broadcast %cst_83 : f32 to vector<8x16xf32>
    %338 = arith.subf %337, %26 : vector<8x16xf32>
    %339 = math.exp %338 : vector<8x16xf32>
    %cst_84 = arith.constant 1.000000e+00 : f32
    %340 = vector.broadcast %cst_84 : f32 to vector<8x16xf32>
    %341 = arith.addf %340, %339 : vector<8x16xf32>
    %cst_85 = arith.constant 1.000000e+00 : f32
    %342 = vector.broadcast %cst_85 : f32 to vector<8x16xf32>
    %343 = arith.divf %342, %341 : vector<8x16xf32>
    %344 = arith.mulf %26, %343 : vector<8x16xf32>
    %345 = arith.mulf %336, %344 : vector<8x16xf32>
    %cst_86 = arith.constant dense<0.000000e+00> : vector<8xf32>
    %346 = vector.multi_reduction <add>, %345, %cst_86 [1] : vector<8x16xf32> to vector<8xf32>
    %347 = vector.shape_cast %346 : vector<8xf32> to vector<8x1xf32>
    %cst_87 = arith.constant 1.600000e+01 : f32
    %348 = vector.broadcast %cst_87 : f32 to vector<8x1xf32>
    %349 = arith.divf %347, %348 : vector<8x1xf32>
    %350 = vector.broadcast %349 : vector<8x1xf32> to vector<8x16xf32>
    %351 = arith.subf %345, %350 : vector<8x16xf32>
    %352 = arith.mulf %351, %351 : vector<8x16xf32>
    %cst_88 = arith.constant dense<0.000000e+00> : vector<8xf32>
    %353 = vector.multi_reduction <add>, %352, %cst_88 [1] : vector<8x16xf32> to vector<8xf32>
    %354 = vector.shape_cast %353 : vector<8xf32> to vector<8x1xf32>
    %cst_89 = arith.constant 1.600000e+01 : f32
    %355 = vector.broadcast %cst_89 : f32 to vector<8x1xf32>
    %356 = arith.divf %354, %355 : vector<8x1xf32>
    %357 = vector.broadcast %349 : vector<8x1xf32> to vector<8x16xf32>
    %358 = arith.subf %345, %357 : vector<8x16xf32>
    %cst_90 = arith.constant 9.99999974E-6 : f32
    %359 = vector.broadcast %cst_90 : f32 to vector<8x1xf32>
    %360 = arith.addf %356, %359 : vector<8x1xf32>
    %361 = math.rsqrt %360 : vector<8x1xf32>
    %362 = vector.broadcast %361 : vector<8x1xf32> to vector<8x16xf32>
    %363 = arith.mulf %358, %362 : vector<8x16xf32>
    %364 = arith.truncf %363 : vector<8x16xf32> to vector<8x16xbf16>
    %c0_91 = arith.constant 0 : index
    %c0_92 = arith.constant 0 : index
    %365 = vector.load %arg14[%c0_91, %c0_92] : memref<16x16xbf16, #tpu.memory_space<vmem>>, vector<16x16xbf16>
    %cst_93 = arith.constant dense<0.000000e+00> : vector<8x16xf32>
    %366 = tpu.matmul %364, %365, %cst_93 {dimension_numbers = #tpu.dot_dimension_numbers<[1], [0], [0], [1], [0, 0, 1, 1], [], []>} : vector<8x16xbf16>, vector<16x16xbf16>, vector<8x16xf32> -> vector<8x16xf32>
    %c0_94 = arith.constant 0 : index
    %c0_95 = arith.constant 0 : index
    %367 = vector.load %arg15[%c0_94, %c0_95] : memref<1x16xf32, #tpu.memory_space<vmem>>, vector<1x16xf32>
    %368 = vector.broadcast %367 : vector<1x16xf32> to vector<8x16xf32>
    %369 = arith.addf %366, %368 : vector<8x16xf32>
    %370 = arith.addf %369, %1 : vector<8x16xf32>
    %c0_96 = arith.constant 0 : index
    %c0_97 = arith.constant 0 : index
    %c0_98 = arith.constant 0 : index
    %371 = vector.load %arg16[%c0_96, %c0_97, %c0_98] : memref<1x8x16xf32, #tpu.memory_space<vmem>>, vector<1x8x16xf32>
    %372 = vector.shape_cast %371 : vector<1x8x16xf32> to vector<8x16xf32>
    %373 = vector.shape_cast %370 : vector<8x16xf32> to vector<1x8x16xf32>
    tpu.vector_store %arg16[%c0_96, %c0_97, %c0_98], %373 {strides = array<i32>} : memref<1x8x16xf32, #tpu.memory_space<vmem>>, vector<1x8x16xf32>,
    return
  }
  func.func @transform_0(%arg0: i32) -> (i32, i32, i32) {
    %c0_i32 = arith.constant 0 : i32
    %c0_i32_0 = arith.constant 0 : i32
    %c0_i32_1 = arith.constant 0 : i32
    return %arg0, %c0_i32, %c0_i32_0 : i32, i32, i32
  }
  func.func @transform_1(%arg0: i32) -> (i32, i32) {
    %c0_i32 = arith.constant 0 : i32
    %c0_i32_0 = arith.constant 0 : i32
    %c0_i32_1 = arith.constant 0 : i32
    return %c0_i32, %c0_i32_0 : i32, i32
  }
  func.func @transform_2(%arg0: i32) -> (i32, i32) {
    %c0_i32 = arith.constant 0 : i32
    %c0_i32_0 = arith.constant 0 : i32
    %c0_i32_1 = arith.constant 0 : i32
    return %c0_i32, %c0_i32_0 : i32, i32
  }
  func.func @transform_3(%arg0: i32) -> (i32, i32) {
    %c0_i32 = arith.constant 0 : i32
    %c0_i32_0 = arith.constant 0 : i32
    %c0_i32_1 = arith.constant 0 : i32
    return %c0_i32, %c0_i32_0 : i32, i32
  }
  func.func @transform_4(%arg0: i32) -> (i32, i32) {
    %c0_i32 = arith.constant 0 : i32
    %c0_i32_0 = arith.constant 0 : i32
    %c0_i32_1 = arith.constant 0 : i32
    return %c0_i32, %c0_i32_0 : i32, i32
  }
  func.func @transform_5(%arg0: i32) -> (i32, i32) {
    %c0_i32 = arith.constant 0 : i32
    %c0_i32_0 = arith.constant 0 : i32
    %c0_i32_1 = arith.constant 0 : i32
    return %c0_i32, %c0_i32_0 : i32, i32
  }
  func.func @transform_6(%arg0: i32) -> (i32, i32) {
    %c0_i32 = arith.constant 0 : i32
    %c0_i32_0 = arith.constant 0 : i32
    %c0_i32_1 = arith.constant 0 : i32
    return %c0_i32, %c0_i32_0 : i32, i32
  }
  func.func @transform_7(%arg0: i32) -> (i32, i32) {
    %c0_i32 = arith.constant 0 : i32
    %c0_i32_0 = arith.constant 0 : i32
    %c0_i32_1 = arith.constant 0 : i32
    return %c0_i32, %c0_i32_0 : i32, i32
  }
  func.func @transform_8(%arg0: i32) -> (i32, i32) {
    %c0_i32 = arith.constant 0 : i32
    %c0_i32_0 = arith.constant 0 : i32
    %c0_i32_1 = arith.constant 0 : i32
    return %c0_i32, %c0_i32_0 : i32, i32
  }
  func.func @transform_9(%arg0: i32) -> (i32, i32) {
    %c0_i32 = arith.constant 0 : i32
    %c0_i32_0 = arith.constant 0 : i32
    %c0_i32_1 = arith.constant 0 : i32
    return %c0_i32, %c0_i32_0 : i32, i32
  }
  func.func @transform_10(%arg0: i32) -> (i32, i32) {
    %c0_i32 = arith.constant 0 : i32
    %c0_i32_0 = arith.constant 0 : i32
    %c0_i32_1 = arith.constant 0 : i32
    return %c0_i32, %c0_i32_0 : i32, i32
  }
  func.func @transform_11(%arg0: i32) -> (i32, i32) {
    %c0_i32 = arith.constant 0 : i32
    %c0_i32_0 = arith.constant 0 : i32
    %c0_i32_1 = arith.constant 0 : i32
    return %c0_i32, %c0_i32_0 : i32, i32
  }
  func.func @transform_12(%arg0: i32) -> (i32, i32) {
    %c0_i32 = arith.constant 0 : i32
    %c0_i32_0 = arith.constant 0 : i32
    %c0_i32_1 = arith.constant 0 : i32
    return %c0_i32, %c0_i32_0 : i32, i32
  }
  func.func @transform_13(%arg0: i32) -> (i32, i32) {
    %c0_i32 = arith.constant 0 : i32
    %c0_i32_0 = arith.constant 0 : i32
    %c0_i32_1 = arith.constant 0 : i32
    return %c0_i32, %c0_i32_0 : i32, i32
  }
  func.func @transform_14(%arg0: i32) -> (i32, i32) {
    %c0_i32 = arith.constant 0 : i32
    %c0_i32_0 = arith.constant 0 : i32
    %c0_i32_1 = arith.constant 0 : i32
    return %c0_i32, %c0_i32_0 : i32, i32
  }
  func.func @transform_15(%arg0: i32) -> (i32, i32, i32) {
    %c0_i32 = arith.constant 0 : i32
    %c0_i32_0 = arith.constant 0 : i32
    %c0_i32_1 = arith.constant 0 : i32
    return %arg0, %c0_i32, %c0_i32_0 : i32, i32, i32
  }
}

</mosaic_0001>

<bundles_post_ra>
// kernel: tpu_custom_call.1
= control target key start
LH: loop header
LB: loop body
LE: loop exit
PB: predicated region body
PF: predicated region fallthrough
CT: control target
= control target key end

     0   :  { %s2759_s0 = inlined_call_operand.hbm [shape: f32[2,8,16], index: 0, kind: input, shape index: {}]   ;;  %s2760_s1 = inlined_call_operand.hbm [shape: bf16[16,16], index: 1, kind: input, shape index: {}]   ;;  %s2761_s2 = inlined_call_operand.hbm [shape: f32[1,16], index: 2, kind: input, shape index: {}]   ;;  %s2762_s3 = inlined_call_operand.hbm [shape: bf16[16,16], index: 3, kind: input, shape index: {}]   ;;  %s2763_s4 = inlined_call_operand.hbm [shape: bf16[16,16], index: 4, kind: input, shape index: {}]   ;;  %s2764_s5 = inlined_call_operand.vmem [shape: bf16[16,16], index: 5, kind: input, shape index: {}]   ;;  %s2765_s6 = inlined_call_operand.hbm [shape: f32[1,16], index: 6, kind: input, shape index: {}]   ;;  %s2766_s7 = inlined_call_operand.hbm [shape: f32[4,16], index: 7, kind: input, shape index: {}]   ;;  %s2767_s8 = inlined_call_operand.hbm [shape: f32[1,16], index: 8, kind: input, shape index: {}]   ;;  %s2768_s9 = inlined_call_operand.vmem [shape: bf16[16,9], index: 9, kind: input, shape index: {}]   ;;  %s2769_s10 = inlined_call_operand.vmem [shape: f32[1,9], index: 10, kind: input, shape index: {}]   ;;  %s2770_s11 = inlined_call_operand.vmem [shape: bf16[1,16], index: 11, kind: input, shape index: {}]   ;;  %s2771_s12 = inlined_call_operand.vmem [shape: f32[1,16], index: 12, kind: input, shape index: {}]   ;;  %s2772_s13 = inlined_call_operand.hbm [shape: bf16[16,16], index: 13, kind: input, shape index: {}]   ;;  %s2773_s14 = inlined_call_operand.vmem [shape: f32[1,16], index: 14, kind: input, shape index: {}]   ;;  %s2774_s15 = inlined_call_operand.hbm [shape: f32[2,8,16], index: 15, kind: output, shape index: {}]  }
   0x1   :  { %2784 = sst [smem:[#allocation29_spill]] %s2760_s1 }
   0x2   :  { %2785 = sst [smem:[#allocation30_spill]] %s2761_s2 }
   0x3   :  { %2786 = sst [smem:[#allocation31_spill]] %s2762_s3 }
   0x4   :  { %2787 = sst [smem:[#allocation32_spill]] %s2763_s4 }
   0x5   :  { %2788 = sst [smem:[#allocation33_spill]] %s2765_s6 }
   0x6   :  { %2789 = sst [smem:[#allocation34_spill]] %s2766_s7 }
   0x7   :  { %2790 = sst [smem:[#allocation35_spill]] %s2767_s8 }
   0x8   :  { %2791 = sst [smem:[#allocation36_spill]] %s2772_s13 }
   0x9   :  { %2792 = sst [smem:[#allocation37_spill]] %s2773_s14 }
   0xa   :  { %2793 = sst [smem:[#allocation38_spill]] %s2774_s15 }
   0xb   :  { %20 = vsyncpa [#allocation8], 0 }
   0xc   :  { %22 = vsyncpa [#allocation8 + $0x1], 0 }
   0xd   :  { %23 = vsyncpa [#allocation11], 0 }
   0xe   :  { %24 = vsyncpa [#allocation14], 0 }
   0xf   :  { %25 = vsyncpa [#allocation17], 0 }
  0x10   :  { %26 = vsyncpa [#allocation20], 0 }
  0x11   :  { %27 = vsyncpa [#allocation9], 0 }
  0x12   :  { %29 = vsyncpa [#allocation9 + $0x1], 0  ;;  %s2326_s18 = smov 0   ;;  %s2328_s19 = smov 0  }
  0x13   :  { %s2330_s20 = smov 0   ;;  %s2332_s21 = smov 0  }
  0x14 LB: > { %s2229_s22 = smov [#allocation10]   ;;  %s2347_s24 = sadd.s32 4294967295, %s2227_s21   ;;  %s2227_s21 = sphi %s2332_s21, %s2831_s21   ;;  %s2223_s20 = sphi %s2330_s20, %s2830_s20   ;;  %s2219_s19 = sphi %s2328_s19, %s2829_s19   ;;  %s2215_s18 = sphi %s2326_s18, %s2828_s18  }
  0x15   : > { %s398_s23 = sshll.u32 %s2229_s22, 4  ;;  %p1629_p0 = scmp.ge.s32.totalorder %s2227_s21, 1  ;;  %s399_s23 = int_to_ptr.vmem [resolvable:$true] %s398_s23 }
  0x16   : > { %p2780_p1 = scmp.eq.s32.totalorder %s2347_s24, 0  ;;  %p386_p2 = scmp.lt.s32.totalorder %s2227_s21, 3 }
  0x17   : > { %s2230_s26 = smov [#allocation13]   ;;  %s2231_s29 = smov [#allocation16]  }
  0x18   : > { %p2352_p3 = pnand %p1629_p0, %p386_p2  ;;  %s422_s27 = sshll.u32 %s2230_s26, 4  ;;  %s2365_s27 = int_to_ptr.vmem [resolvable:$true] %s422_s27 }
  0x19   : > { %s452_s30 = sshll.u32 %s2231_s29, 4  ;;  %s1922_s17 = scalar_lea.vmem %s399_s23, 128  ;;  %s2367_s30 = int_to_ptr.vmem [resolvable:$true] %s452_s30 }
  0x1a   : > { %s2794_s25 = scalar_select %p2352_p3, 1, 0 }
  0x1b   : > { %p1773_p5 = pneg %p2352_p3  ;;  %p1923_p8 = scmp.ne.s32.totalorder %s399_s23, %s1922_s17 }
  0x1c   : > { %p1930_p11 = scmp.lt.s32.totalorder %s399_s23, %s399_s23  ;;  %p1931_p12 = scmp.lt.s32.totalorder %s1922_s17, %s1922_s17 }
  0x1d   : > { %p2361_p6 = pnand %p1773_p5, %p2780_p1 }
  0x1e   : > { %p1932_p13 = por %p1931_p12, %p1930_p11 }
  0x1f   : > { %p2371_p7 = pneg %p2361_p6 }
  0x21   : > { %p1925_p9 = pnand %p1923_p8, %p2371_p7 }
  0x23   : > { %p1926_p10 = pneg %p1925_p9 }
  0x25   : > { %p1933_p0 = pnand %p1932_p13, %p1926_p10 }
  0x27   : > { %1936 = shalt.err (!%p1933_p0)
}
  0x28   : > { %s2776_s22 = smov 64   ;;  %s2778_s26 = smov 4  }
  0x29   : > { %s2797_s1 = sld [smem:[#allocation29_spill]]  ;;  %s1948_s14 = scalar_lea.vmem %s2365_s27, 128 }
  0x2a   : > { %p1949_p2 = scmp.ne.s32.totalorder %s2365_s27, %s1948_s14  ;;  %p1956_p9 = scmp.lt.s32.totalorder %s2365_s27, %s2365_s27 }
  0x2b   : > { %p1957_p10 = scmp.lt.s32.totalorder %s1948_s14, %s1948_s14 }
  0x2c   : > { %p1951_p5 = pnand %p1949_p2, %p2371_p7 }
  0x2d   : > { %p1958_p11 = por %p1957_p10, %p1956_p9 }
  0x2e   : > { %p1952_p8 = pneg %p1951_p5 }
  0x2f   : > { %1776 = dma.hbm_to_vmem [thread:$0]  (!%p2361_p6), %s2797_s1, 128, %s399_s23, [#allocation11], %s2776_s22, %s2776_s22, %s2778_s26  }
  0x30   : > { %p1959_p12 = pnand %p1958_p11, %p1952_p8 }
  0x32   : > { %1962 = shalt.err (!%p1959_p12)
}
  0x33   : > { %s2798_s3 = sld [smem:[#allocation31_spill]]  ;;  %s1974_s23 = scalar_lea.vmem %s2367_s30, 16 }
  0x34   : > { %p1975_p13 = scmp.ne.s32.totalorder %s2367_s30, %s1974_s23  ;;  %s1981_s14 = scalar_lea.vmem %s2367_s30, 32 }
  0x35   : > { %p1982_p5 = scmp.lt.s32.totalorder %s2367_s30, %s2367_s30  ;;  %p1983_p8 = scmp.lt.s32.totalorder %s1981_s14, %s1974_s23 }
  0x36   : > { %p1977_p0 = pnand %p1975_p13, %p2371_p7 }
  0x37   : > { %p1984_p9 = por %p1983_p8, %p1982_p5 }
  0x38   : > { %p1978_p2 = pneg %p1977_p0 }
  0x39   : > { %1782 = dma.hbm_to_vmem [thread:$0]  (!%p2361_p6), %s2798_s3, 128, %s2365_s27, [#allocation14], %s2776_s22, %s2776_s22, %s2778_s26  }
  0x3a   : > { %p1985_p10 = pnand %p1984_p9, %p1978_p2 }
  0x3c   : > { %1988 = shalt.err (!%p1985_p10)
}
  0x3d   : > { %s2799_s6 = sld [smem:[#allocation33_spill]]  ;;  %s2234_s27 = smov [#allocation19]  }
  0x3e   : > { %s474_s15 = sshll.u32 %s2234_s27, 4  ;;  %s2235_s22 = smov [#allocation12]   ;;  %s475_s15 = int_to_ptr.vmem [resolvable:$true] %s474_s15 }
  0x3f   : > { %s412_s26 = sshll.u32 %s2235_s22, 4  ;;  %s2000_s1 = scalar_lea.vmem %s475_s15, 16  ;;  %s413_s26 = int_to_ptr.vmem [resolvable:$true] %s412_s26 }
  0x40   : > { %p2001_p11 = scmp.ne.s32.totalorder %s475_s15, %s2000_s1  ;;  %s2007_s23 = scalar_lea.vmem %s475_s15, 32 }
  0x41   : > { %p2008_p0 = scmp.lt.s32.totalorder %s475_s15, %s475_s15  ;;  %p2009_p2 = scmp.lt.s32.totalorder %s2007_s23, %s2000_s1 }
  0x42   : > { %p2003_p12 = pnand %p2001_p11, %p2371_p7 }
  0x43   : > { %1788 = dma.hbm_to_vmem [thread:$0]  (!%p2361_p6), %s2799_s6, 16, %s2367_s30, [#allocation17]  }
  0x44   : > { %p2004_p13 = pneg %p2003_p12  ;;  %p2010_p5 = por %p2009_p2, %p2008_p0 }
  0x46   : > { %p2011_p8 = pnand %p2010_p5, %p2004_p13 }
  0x48   : > { %2014 = shalt.err (!%p2011_p8)
}
  0x49   : > { %s2800_s8 = sld [smem:[#allocation35_spill]]  ;;  %s2026_s22 = scalar_lea.vmem %s413_s26, 16 }
  0x4a   : > { %p2027_p9 = scmp.ne.s32.totalorder %s413_s26, %s2026_s22  ;;  %s2033_s29 = scalar_lea.vmem %s413_s26, 32 }
  0x4b   : > { %p2034_p12 = scmp.lt.s32.totalorder %s413_s26, %s413_s26  ;;  %p2035_p4 = scmp.lt.s32.totalorder %s2033_s29, %s2026_s22 }
  0x4c   : > { %p2029_p10 = pnand %p2027_p9, %p2371_p7 }
  0x4d   : > { %p2036_p1 = por %p2035_p4, %p2034_p12 }
  0x4e   : > { %p2030_p11 = pneg %p2029_p10 }
  0x4f   : > { %1794 = dma.hbm_to_vmem [thread:$0]  (!%p2361_p6), %s2800_s8, 16, %s475_s15, [#allocation20]  }
  0x50   : > { %p2037_p0 = pnand %p2036_p1, %p2030_p11 }
  0x52   : > { %2040 = shalt.err (!%p2037_p0)
}
  0x53   : > { %s2801_s2 = sld [smem:[#allocation30_spill]]  ;;  %s2236_s27 = smov [#allocation15]  }
  0x54   : > { %s435_s15 = sshll.u32 %s2236_s27, 4  ;;  %s2237_s23 = smov [#allocation18]   ;;  %s436_s15 = int_to_ptr.vmem [resolvable:$true] %s435_s15 }
  0x55   : > { %s463_s14 = sshll.u32 %s2237_s23, 4  ;;  %s2052_s30 = scalar_lea.vmem %s436_s15, 128  ;;  %s464_s14 = int_to_ptr.vmem [resolvable:$true] %s463_s14 }
  0x56   : > { %p2053_p13 = scmp.ne.s32.totalorder %s436_s15, %s2052_s30  ;;  %p2060_p4 = scmp.lt.s32.totalorder %s436_s15, %s436_s15 }
  0x57   : > { %p2061_p1 = scmp.lt.s32.totalorder %s2052_s30, %s2052_s30 }
  0x58   : > { %p2055_p2 = pnand %p2053_p13, %p2371_p7 }
  0x59   : > { %1779 = dma.hbm_to_vmem [thread:$0]  (!%p2361_p6), %s2801_s2, 16, %s413_s26, [#allocation11]  }
  0x5a   : > { %p2056_p5 = pneg %p2055_p2  ;;  %p2062_p8 = por %p2061_p1, %p2060_p4 }
  0x5c   : > { %p2063_p9 = pnand %p2062_p8, %p2056_p5 }
  0x5e   : > { %2066 = shalt.err (!%p2063_p9)
}
  0x5f   : > { %s2802_s22 = smov 4   ;;  %s2803_s29 = smov 64  }
  0x60   : > { %s2804_s4 = sld [smem:[#allocation32_spill]]  ;;  %s2078_s17 = scalar_lea.vmem %s464_s14, 64 }
  0x61   : > { %p2079_p10 = scmp.ne.s32.totalorder %s464_s14, %s2078_s17  ;;  %p2086_p0 = scmp.lt.s32.totalorder %s464_s14, %s464_s14 }
  0x62   : > { %p2087_p13 = scmp.lt.s32.totalorder %s2078_s17, %s2078_s17 }
  0x63   : > { %p2081_p11 = pnand %p2079_p10, %p2371_p7 }
  0x64   : > { %p2088_p2 = por %p2087_p13, %p2086_p0 }
  0x65   : > { %p2082_p12 = pneg %p2081_p11 }
  0x66   : > { %1785 = dma.hbm_to_vmem [thread:$0]  (!%p2361_p6), %s2804_s4, 128, %s436_s15, [#allocation14], %s2803_s29, %s2803_s29, %s2802_s22  }
  0x67   : > { %p2089_p5 = pnand %p2088_p2, %p2082_p12 }
  0x69   : > { %2092 = shalt.err (!%p2089_p5)
}
  0x6a   : > { %s2805_s7 = sld [smem:[#allocation34_spill]]  ;;  %s2238_s30 = smov [#allocation21]  }
  0x6b   : > { %s496_s15 = sshll.u32 %s2238_s30, 4  ;;  %s497_s15 = int_to_ptr.vmem [resolvable:$true] %s496_s15 }
  0x6c   : > { %s2104_s26 = scalar_lea.vmem %s497_s15, 128  ;;  %p2112_p9 = scmp.lt.s32.totalorder %s497_s15, %s497_s15 }
  0x6d   : > { %p2105_p4 = scmp.ne.s32.totalorder %s497_s15, %s2104_s26  ;;  %p2113_p10 = scmp.lt.s32.totalorder %s2104_s26, %s2104_s26 }
  0x6f   : > { %p2107_p1 = pnand %p2105_p4, %p2371_p7  ;;  %p2114_p11 = por %p2113_p10, %p2112_p9 }
  0x70   : > { %1791 = dma.hbm_to_vmem [thread:$0]  (!%p2361_p6), %s2805_s7, 64, %s464_s14, [#allocation17]  }
  0x71   : > { %p2108_p8 = pneg %p2107_p1 }
  0x73   : > { %p2115_p12 = pnand %p2114_p11, %p2108_p8 }
  0x75   : > { %2118 = shalt.err (!%p2115_p12)
}
  0x76   : > { %s2806_s13 = sld [smem:[#allocation36_spill]]  ;;  %s1628_s28 = sadd.s32 4294967294, %s2227_s21  }
  0x77   : > { %s2456_s16 = sadd.s32 1, %s2227_s21   ;;  %s42_s27 = sadd.s32 1, %s2223_s20 }
  0x78   : > { %s39_s17 = ssub.s32 %s2227_s21, %s2456_s16  ;;  %p49_p0 = scmp.ne.s32.totalorder %s2223_s20, %s2219_s19 }
  0x79   : > { %p40_p7 = scmp.eq.s32.totalorder %s39_s17, 0  ;;  %p50_p13 = scmp.eq.s32.totalorder %s2227_s21, 0 }
  0x7a   : > { %p55_p2 = scmp.ne.s32.totalorder %s2219_s19, %s2215_s18  ;;  %p2808_p4 = scmp.eq.s32.totalorder %s2347_s24, 0 }
  0x7b   : > { %s2467_s23 = scalar_select %p40_p7, %s2223_s20, %s42_s27  }
  0x7c   : > { %1797 = dma.hbm_to_vmem [thread:$0]  (!%p2361_p6), %s2806_s13, 128, %s497_s15, [#allocation20], %s2803_s29, %s2803_s29, %s2802_s22  }
  0x7d   : > { %p2469_p5 = por %p50_p13, %p49_p0  ;;  %p2475_p6 = por %p2808_p4, %p55_p2 }
  0x7e   : > { %p373_p1 = scmp.eq.s32.totalorder %s2347_s24, 1  ;;  %p379_p8 = scmp.eq.s32.totalorder %s1628_s28, 1 }
  0x7f   : > { %s2809_s22 = scalar_select %p2475_p6, 1, 0 }
  0x80   : > { %p1814_p9 = scmp.lt.s32.totalorder %s2227_s21, 2  ;;  %s513_s29 = sand.u32 1, %s2223_s20  }
  0x81   : > { %p2482_p10 = por %p373_p1, %p49_p0  ;;  %p2486_p11 = por %p379_p8, %p55_p2 }
  0x82   : > { %s1639_s1 = sshll.u32 %s513_s29, 3  ;;  %s1640_s14 = sshll.u32 %s2227_s21, 7 }
  0x83   : > { %s2810_s15 = scalar_select %p2482_p10, 1, 0 }
  0x84   : > { %s2811_s26 = scalar_select %p2486_p11, 1, 0 }
  0x85   : > { %s2494_s2 = scalar_lea.hbm %s2759_s0, %s1640_s14  ;;  %s517_s28 = scalar_lea.vmem [#allocation7], %s1639_s1 }
  0x86   : > { %s524_s3 = sshll.u32 %s517_s28, 4  ;;  %p2498_p12 = pnand %p1814_p9, %p2469_p5  ;;  %s525_s3 = int_to_ptr.vmem [resolvable:$true] %s524_s3 }
  0x87   : > { %s514_s6 = scalar_lea.sflag [#allocation8], %s513_s29  ;;  %s2119_s7 = scalar_lea.hbm %s2494_s2, 128 }
  0x88   : > { %p2120_p7 = scmp.ne.s32.totalorder %s2494_s2, %s2119_s7  ;;  %p2121_p0 = pneg %p2498_p12 }
  0x89   : > { %s2124_s27 = scalar_lea.hbm %s2759_s0, 256  ;;  %p2125_p4 = scmp.lt.s32.totalorder %s2494_s2, %s2759_s0 }
  0x8a   : > { %p2122_p13 = pnand %p2121_p0, %p2120_p7  ;;  %p2126_p5 = scmp.lt.s32.totalorder %s2124_s27, %s2119_s7 }
  0x8c   : > { %p2123_p2 = pneg %p2122_p13  ;;  %p2127_p1 = por %p2126_p5, %p2125_p4 }
  0x8e   : > { %p2128_p8 = pnand %p2127_p1, %p2123_p2 }
  0x90   : > { %2131 = shalt.err (!%p2128_p8)
}
  0x91   : > { %s2132_s30 = scalar_lea.vmem %s525_s3, 128  ;;  %s2239_s29 = smov [#allocation7]  }
  0x92   : > { %p2133_p9 = scmp.ne.s32.totalorder %s525_s3, %s2132_s30  ;;  %s2137_s8 = sshll.u32 %s2239_s29, 4  ;;  %s2138_s8 = int_to_ptr.vmem [resolvable:$false] %s2137_s8 }
  0x93   : > { %s2139_s13 = scalar_lea.vmem %s2138_s8, 256  ;;  %p2140_p7 = scmp.lt.s32.totalorder %s525_s3, %s2138_s8 }
  0x94   : > { %p2135_p11 = pnand %p2133_p9, %p2121_p0  ;;  %p2141_p13 = scmp.lt.s32.totalorder %s2139_s13, %s2132_s30 }
  0x96   : > { %p2136_p10 = pneg %p2135_p11  ;;  %p2142_p6 = por %p2141_p13, %p2140_p7 }
  0x98   : > { %p2143_p3 = pnand %p2142_p6, %p2136_p10 }
  0x9a   : > { %2146 = shalt.err (!%p2143_p3)
}
  0x9b   : > { %1801 = dma.hbm_to_vmem [thread:$0]  (!%p2498_p12), %s2494_s2, 128, %s525_s3, %s514_s6  }
  0x9c   : > { %p2813_p2 = scmp.ne.s32.totalorder %s2794_s25, 0 }
  0x9d   : > { %s2519_s7 = sand.u32 (!%p2813_p2), 1, %s2219_s19   ;;  %p2814_p6 = scmp.ne.s32.totalorder (!%p2813_p2), %s2809_s22, 0 }
  0x9e   : > { %533 = sbr.rel (%p2813_p2) target bundleno = 2304 (0x900), region = 80  ;;  %s1642_s14 = sshll.u32 (!%p2813_p2), %s2519_s7, 3 }
  0x9f   : > { %s536_s8 = scalar_lea.sflag (!%p2813_p2), [#allocation8], %s2519_s7  ;;  %s539_s13 = scalar_lea.vmem (!%p2813_p2), [#allocation7], %s1642_s14 }
  0xa3   : > { %2190 = dma.done.wait (%p2814_p6), %s536_s8, 128  }
  0xa4   : > { %2192 = vsyncadd (%p2814_p6), %s536_s8, 4294967168  ;;  %p2815_p3 = scmp.eq.s32.totalorder %s2347_s24, 0 }
  0xa6   : > { %2194 = dma.done.wait (%p2815_p3), [#allocation11], 144   ;;  %p2816_p10 = pmov %p2815_p3 }
  0xa7   : > { %p2817_p11 = pmov %p2815_p3 }
  0xa8   : > { %2196 = vsyncadd (%p2816_p10), [#allocation11], 4294967152 }
  0xa9   : > { %2198 = dma.done.wait (%p2817_p11), [#allocation14], 256   ;;  %p2818_p12 = pmov %p2815_p3 }
  0xaa   : > { %p2819_p0 = pmov %p2815_p3 }
  0xab   : > { %2200 = vsyncadd (%p2818_p12), [#allocation14], 4294967040 }
  0xac   : > { %2202 = dma.done.wait (%p2819_p0), [#allocation17], 80   ;;  %p2820_p4 = pmov %p2819_p0 }
  0xad   : > { %p2821_p5 = pmov %p2819_p0 }
  0xae   : > { %2204 = vsyncadd (%p2820_p4), [#allocation17], 4294967216 }
  0xaf   : > { %2206 = dma.done.wait (%p2821_p5), [#allocation20], 144   ;;  %p2822_p1 = pmov %p2819_p0 }
  0xb0   : > { %vm620_vm0 = vcmask 130048   ;;  %v2545_v0 = vld [vmem:[%s539_s13] sm:$0xff]  ;;  %v1871_v16 = vld [vmem:[#allocation10] sm:$0xff]   ;;  %v2240_v18 = vmov 0.0   ;;  %vm2241_vm1 = vmmov 0   ;;  %v715_v29 = vlaneseq  ;;  %v1874_v35 = vld [vmem:[%s2764_s5] sm:$0xff]  }
  0xb1   : > { %2208 = vsyncadd (%p2822_p1), [#allocation20], 4294967152  ;;  %v621_v1 = vsel %vm620_vm0, %v2545_v0, 0.0  ;;  %1689 = vmatprep.subr.bf16.mxu0 %v2240_v18  ;;  %1695 = vmatprep.subr.bf16.mxu1 %v2240_v18  ;;  %v1872_v27 = vld [vmem:[#allocation15] sm:$0xff]   ;;  %v1873_v28 = vld [vmem:[#allocation13] sm:$0xff]   ;;  %vm996_vm4 = vcmask 1040384  }
  0xb2   : > { %622 = vadd.xlane.f32.xlu0 %v621_v1  ;;  %1690 = vmatpush3.bf16.msra.mxu0 %v1871_v16  ;;  %v1652_v30 = vld [vmem:[#allocation12] ss:$0 sm:$0xff]  ;;  %v2563_v31 = vshrl.u32 %v715_v29, 7  ;;  %v1661_v55 = vld [vmem:[#allocation16] ss:$0 sm:$0xff]  ;;  %v2242_v29 = vmov 0  }
  0xb3   : > { %1701 = vmatprep.subr.bf16.mxu0 %v2240_v18  ;;  %1691 = vmatprep.mubr.msk.bf16.mxu0 %vm2241_vm1, %v2240_v18  ;;  %v1875_v45 = vld [vmem:[%s2768_s9] sm:$0xff]   ;;  %vm1059_vm5 = vcmask 31744   ;;  %vm992_vm6 = vcmask 7168   ;;  %vm1101_vm9 = vcmask 125952   ;;  %vm1362_vm10 = vcmask 1041408   ;;  %s2823_s17 = sld [smem:[#allocation37_spill]] }
  0xb4   : > { %1697 = vmatprep.mubr.msk.bf16.mxu1 %vm2241_vm1, %v2240_v18  ;;  %1696 = vmatpush3.bf16.msra.mxu1 %v1872_v27  ;;  %vm717_vm2 = vcmp.eq.s32.totalorder %v2563_v31, 0  ;;  %vm722_vm3 = vcmp.eq.s32.totalorder %v2563_v31, 7  ;;  %vm1364_vm11 = vcmask 1042432   ;;  %vm1366_vm12 = vcmask 1043456   ;;  %s1672_s27 = sshll.u32 %s2347_s24, 7  ;;  %s617_s1 = scalar_lea.vmem [#allocation22], %s1642_s14 }
  0xb5   : > { %1707 = vmatprep.subr.bf16.mxu1 %v2240_v18  ;;  %vm1368_vm13 = vcmask 1044480   ;;  %vm1370_vm14 = vcmask 1045504   ;;  %vm1372_vm15 = vcmask 1046528   ;;  %s1482_s28 = sshll.u32 %s617_s1, 4  ;;  %s2824_s8 = sld [smem:[#allocation38_spill]]  ;;  %s2717_s28 = int_to_ptr.vmem [resolvable:$true] %s1482_s28 }
  0xb6   : > { %s1469_s24 = scalar_lea.sflag [#allocation9], %s2519_s7  ;;  %s2147_s14 = scalar_lea.vmem %s2717_s28, 128 }
  0xb7   : > { %p2148_p8 = scmp.ne.s32.totalorder %s2717_s28, %s2147_s14  ;;  %p2825_p9 = scmp.ne.s32.totalorder %s2810_s15, 0 }
  0xb9   : > { %p2149_p7 = pnand %p2148_p8, %p2825_p9 }
  0xbb   : > { %s2715_s13 = scalar_lea.hbm %s2824_s8, %s1672_s27  ;;  %p2150_p13 = pneg %p2149_p7 }
 0x13b   : > { %v623_v2 = vpop.xlane.xlu0 %622 }
 0x13c   : > { %v624_v3 = vrot.slane %v623_v2, 4 }
 0x13e   : > { %v625_v4 = vadd.f32 %v624_v3, %v623_v2 }
 0x140   : > { %v626_v5 = vrot.slane %v625_v4, 2 }
 0x142   : > { %v627_v6 = vadd.f32 %v626_v5, %v625_v4 }
 0x144   : > { %v628_v7 = vrot.slane %v627_v6, 1 }
 0x146   : > { %v629_v8 = vadd.f32 %v628_v7, %v627_v6 }
 0x148   : > { %1731 = vpush %v629_v8 }
 0x179   : > { %s1732_s2 = spop %1731 }
 0x17a   : > { %s633_s3 = smul.f32 0.0078125, %s1732_s2  ;;  %s2243_s2 = smov 120  }
 0x17c   : > { %v634_v9 = vstv %s633_s3  ;;  %s2244_s3 = smov 124  }
 0x17d   : > { %v635_v10 = vsub.f32 %v2545_v0, %v634_v9 }
 0x17f   : > { %v636_v11 = vmul.f32 %v635_v10, %v635_v10 }
 0x181   : > { %v637_v12 = vsel %vm620_vm0, %v636_v11, 0.0 }
 0x182   : > { %638 = vadd.xlane.f32.xlu0 %v637_v12 }
 0x20b   : > { %v639_v13 = vpop.xlane.xlu0 %638 }
 0x20c   : > { %v640_v14 = vrot.slane %v639_v13, 4 }
 0x20e   : > { %v641_v15 = vadd.f32 %v640_v14, %v639_v13 }
 0x210   : > { %v642_v17 = vrot.slane %v641_v15, 2 }
 0x212   : > { %v643_v19 = vadd.f32 %v642_v17, %v641_v15 }
 0x214   : > { %v644_v20 = vrot.slane %v643_v19, 1 }
 0x216   : > { %v645_v21 = vadd.f32 %v644_v20, %v643_v19 }
 0x218   : > { %1733 = vpush %v645_v21 }
 0x249   : > { %s1734_s4 = spop %1733 }
 0x24a   : > { %s649_s6 = smul.f32 0.0078125, %s1734_s4 }
 0x24c   : > { %s650_s25 = sadd.f32 1e-05, %s649_s6 }
 0x24e   : > { %v651_v22 = vstv %s650_s25 }
 0x24f   : > { %1877 = vrsqrt.f32 %v651_v22 }
 0x25c   : > { %v1878_v23 = vpop.eup %1877 }
 0x25d   : > { %1735 = vpush %v1878_v23 }
 0x28e   : > { %s1736_s22 = spop %1735 }
 0x28f   : > { %v654_v24 = vstv %s1736_s22 }
 0x290   : > { %v655_v25 = vmul.f32 %v654_v24, %v635_v10 }
 0x292   : > { %v656_v26 = vpack.c.bf16 %v655_v25, %v655_v25 }
 0x294   : > { %1692 = vmatmul.mubr.msk.bf16.vlgmr.msra.gmra.mxu0 %vm620_vm0, %v656_v26 }
 0x295   : > { %1703 = vmatprep.mubr.msk.bf16.mxu0 %vm2241_vm1, %v2240_v18  ;;  %1702 = vmatpush3.bf16.msra.mxu0 %v1873_v28  ;;  %v981_v28 = vld [vmem:[%s2770_s11] sm:$0x1] }
 0x296   : > { %1713 = vmatprep.subr.bf16.mxu0 %v2240_v18 }
 0x354   : > { %v709_v32 = vpop.f32.mrf.mxu0 }
 0x355   : > { %v2565_v33 = vadd.f32 %v1652_v30, %v709_v32  ;;  %v998_v30 = vsel %vm996_vm4, 65535, %v2242_v29  ;;  %v1066_v29 = vld [vmem:[#allocation18] sm:$0xf] }
 0x356   : > { %v1693_v34 = vpop.f32.mrf.mxu0  ;;  %v1000_v32 = vand.u32 %v998_v30, %v981_v28 }
 0x357   : > { %v718_v36 = vrot.slane %v2565_v33, 7  ;;  %v730_v37 = vpack.c.bf16 %v2565_v33, %v2565_v33  ;;  %v723_v38 = vrot.slane %v2565_v33, 1  ;;  %v1662_v34 = vld [vmem:[%s2769_s10] ss:$0 sm:$0xff] }
 0x358   : > { %v712_v39 = vpop.f32.mrf.mxu0 }
 0x359   : > { %1698 = vmatmul.mubr.msk.bf16.vlgmr.msra.gmra.mxu1 %vm620_vm0, %v730_v37  ;;  %v721_v40 = vsel %vm717_vm2, 0.0, %v718_v36  ;;  %v726_v43 = vsel %vm722_vm3, 0.0, %v723_v38 }
 0x35a   : > { %1708 = vmatpush3.bf16.msra.mxu1 %v1874_v35  ;;  %v1694_v41 = vpop.f32.mrf.mxu0  ;;  %v727_v42 = vpack.c.bf16 %v721_v40, %v721_v40  ;;  %1709 = vmatprep.mubr.msk.bf16.mxu1 %vm2241_vm1, %v2240_v18  ;;  %v831_v44 = vpack.c.bf16 %v726_v43, %v726_v43  ;;  %v2608_v40 = vsub.s32 0, %v2563_v31 }
 0x35b   : > { %1719 = vmatprep.subr.bf16.mxu1 %v2240_v18  ;;  %v2611_v41 = vsub.s32 1, %v2563_v31 }
 0x35c   : > { %1704 = vmatmul.mubr.msk.bf16.vlgmr.msra.gmra.mxu0 %vm620_vm0, %v727_v42 }
 0x35d   : > { %1715 = vmatprep.mubr.msk.bf16.mxu0 %vm2241_vm1, %v2240_v18  ;;  %1714 = vmatpush3.bf16.msra.mxu0 %v1875_v45  ;;  %v2616_v45 = vsub.s32 7, %v2563_v31 }
 0x35e   : > { %1725 = vmatprep.subr.bf16.mxu0 %v2240_v18 }
 0x361   : > { %1710 = vmatmul.mubr.msk.bf16.vlgmr.msra.gmra.mxu1 %vm620_vm0, %v831_v44 }
 0x362   : > { %1721 = vmatprep.mubr.msk.bf16.mxu1 %vm2241_vm1, %v2240_v18  ;;  %1720 = vmatpush3.bf16.msra.mxu1 %v1000_v32 }
 0x419   : > { %v776_v46 = vpop.f32.mrf.mxu1 }
 0x41b   : > { %v1699_v47 = vpop.f32.mrf.mxu1 }
 0x41c   : > { %v825_v48 = vpop.f32.mrf.mxu0 }
 0x41d   : > { %v779_v49 = vpop.f32.mrf.mxu1  ;;  %v826_v52 = vadd.f32 %v825_v48, %v776_v46  ;;  %v2619_v46 = vsub.s32 2, %v2563_v31 }
 0x41e   : > { %v1705_v50 = vpop.f32.mrf.mxu0  ;;  %v2624_v49 = vsub.s32 3, %v2563_v31 }
 0x41f   : > { %v1700_v51 = vpop.f32.mrf.mxu1 }
 0x420   : > { %v828_v53 = vpop.f32.mrf.mxu0  ;;  %v2628_v51 = vsub.s32 4, %v2563_v31 }
 0x421   : > { %v877_v54 = vpop.f32.mrf.mxu1  ;;  %v2632_v53 = vsub.s32 5, %v2563_v31 }
 0x422   : > { %v883_v56 = vadd.f32 %v877_v54, %v826_v52  ;;  %v1706_v57 = vpop.f32.mrf.mxu0 }
 0x423   : > { %v1711_v58 = vpop.f32.mrf.mxu1 }
 0x424   : > { %v891_v59 = vadd.f32 %v1661_v55, %v883_v56  ;;  %v2636_v55 = vsub.s32 6, %v2563_v31 }
 0x425   : > { %v880_v60 = vpop.f32.mrf.mxu1 }
 0x426   : > { %v892_v61 = vsel %vm620_vm0, %v891_v59, 0.0 }
 0x427   : > { %v893_v62 = vrot.slane %v892_v61, 4  ;;  %v1712_v63 = vpop.f32.mrf.mxu1 }
 0x429   : > { %v894_v1 = vadd.f32 %v893_v62, %v892_v61 }
 0x42b   : > { %v895_v2 = vrot.slane %v894_v1, 2 }
 0x42d   : > { %v896_v3 = vadd.f32 %v895_v2, %v894_v1 }
 0x42f   : > { %v897_v4 = vrot.slane %v896_v3, 1 }
 0x431   : > { %v898_v5 = vadd.f32 %v897_v4, %v896_v3  ;;  %v1665_v4 = vld [vmem:[%s2771_s12] ss:$0 sm:$0xff] }
 0x433   : > { %v900_v6 = vmul.f32 0.125, %v898_v5 }
 0x435   : > { %v901_v7 = vsub.f32 %v891_v59, %v900_v6 }
 0x437   : > { %v902_v8 = vmul.f32 %v901_v7, %v901_v7 }
 0x439   : > { %v903_v9 = vsel %vm620_vm0, %v902_v8, 0.0 }
 0x43a   : > { %v904_v10 = vrot.slane %v903_v9, 4 }
 0x43c   : > { %v905_v11 = vadd.f32 %v904_v10, %v903_v9 }
 0x43e   : > { %v906_v12 = vrot.slane %v905_v11, 2 }
 0x440   : > { %v907_v13 = vadd.f32 %v906_v12, %v905_v11 }
 0x442   : > { %v908_v14 = vrot.slane %v907_v13, 1 }
 0x444   : > { %v909_v15 = vadd.f32 %v908_v14, %v907_v13 }
 0x446   : > { %v910_v16 = vmul.f32 0.125, %v909_v15 }
 0x448   : > { %v911_v17 = vadd.f32 1e-05, %v910_v16 }
 0x44a   : > { %1879 = vrsqrt.f32 %v911_v17 }
 0x457   : > { %v1880_v19 = vpop.eup %1879 }
 0x458   : > { %v913_v20 = vmul.f32 %v1880_v19, %v901_v7 }
 0x45a   : > { %v914_v21 = vsub.f32 0.0, %v913_v20 }
 0x45c   : > { %v915_v22 = vmul.f32 1.442695, %v914_v21 }
 0x45e   : > { %1881 = vpow2.f32 %v915_v22 }
 0x46b   : > { %v1882_v23 = vpop.eup %1881 }
 0x46c   : > { %v917_v24 = vadd.f32 1.0, %v1882_v23 }
 0x46e   : > { %1883 = vrcp.f32 %v917_v24 }
 0x47b   : > { %v1884_v25 = vpop.eup %1883 }
 0x47c   : > { %v2592_v26 = vmul.f32 %v1884_v25, %v913_v20 }
 0x47e   : > { %v921_v27 = vpack.c.bf16 %v2592_v26, %v2592_v26 }
 0x480   : > { %1716 = vmatmul.mubr.msk.bf16.vlgmr.msra.gmra.mxu0 %vm620_vm0, %v921_v27 }
 0x481   : > { %1727 = vmatprep.mubr.msk.bf16.mxu0 %vm2241_vm1, %v2240_v18 }
 0x540   : > { %v974_v35 = vpop.f32.mrf.mxu0 }
 0x541   : > { %v975_v36 = vadd.f32 %v1662_v34, %v974_v35 }
 0x542   : > { %v1717_v37 = vpop.f32.mrf.mxu0 }
 0x543   : > { %1060 = vst.msk [vmem:[#allocation4] sm:$0xff] %vm1059_vm5, %v975_v36  ;;  %v980_v18 = vpack.c.bf16 %v975_v36, %v975_v36 }
 0x544   : > { %v977_v38 = vpop.f32.mrf.mxu0 }
 0x545   : > { %990 = vrot.lane.b32.xlu1 %v980_v18, %s2243_s2  ;;  %s2245_s2 = smov [#allocation22]  }
 0x546   : > { %v1718_v39 = vpop.f32.mrf.mxu0 }
 0x549   : > { %1062 = vrot.lane.b32.xlu1 %v975_v36, %s2244_s3  ;;  %s2151_s3 = sshll.u32 %s2245_s2, 4  ;;  %s2152_s3 = int_to_ptr.vmem [resolvable:$false] %s2151_s3 }
 0x54a   : > { %v1069_v42 = vld [vmem:[#allocation4] sm:$0xff]  ;;  %s2153_s4 = scalar_lea.vmem %s2152_s3, 256  ;;  %p2154_p2 = scmp.lt.s32.totalorder %s2717_s28, %s2152_s3 }
 0x54b   : > { %v1083_v43 = vrot.slane %v1069_v42, %v2608_v40  ;;  %v1120_v44 = vrot.slane %v1069_v42, %v2611_v41  ;;  %v1336_v47 = vrot.slane %v1069_v42, %v2616_v45  ;;  %v1156_v48 = vrot.slane %v1069_v42, %v2619_v46  ;;  %p2155_p6 = scmp.lt.s32.totalorder %s2153_s4, %s2147_s14 }
 0x54c   : > { %v1192_v50 = vrot.slane %v1069_v42, %v2624_v49  ;;  %v1228_v52 = vrot.slane %v1069_v42, %v2628_v51  ;;  %v1264_v54 = vrot.slane %v1069_v42, %v2632_v53  ;;  %v1300_v56 = vrot.slane %v1069_v42, %v2636_v55 }
 0x54d   : > { %1085 = vbcast.lane.b32.xlu0 %v1083_v43, 256  ;;  %1122 = vbcast.lane.b32.xlu1 %v1120_v44, 256  ;;  %p2156_p3 = por %p2155_p6, %p2154_p2 }
 0x54f   : > { %p2157_p10 = pnand %p2156_p3, %p2150_p13 }
 0x551   : > { %1338 = vbcast.lane.b32.xlu0 %v1336_v47, 256  ;;  %1158 = vbcast.lane.b32.xlu1 %v1156_v48, 256 }
 0x555   : > { %1194 = vbcast.lane.b32.xlu1 %v1192_v50, 256 }
 0x559   : > { %1230 = vbcast.lane.b32.xlu1 %v1228_v52, 256 }
 0x55d   : > { %1266 = vbcast.lane.b32.xlu1 %v1264_v54, 256 }
 0x561   : > { %1302 = vbcast.lane.b32.xlu1 %v1300_v56, 256 }
 0x5b7   : > { %v991_v57 = vpop.permute.xlu1 %990 }
 0x5b8   : > { %1722 = vmatmul.mubr.msk.bf16.vlgmr.msra.gmra.mxu1 %vm992_vm6, %v991_v57 }
 0x5bb   : > { %v1063_v58 = vpop.permute.xlu1 %1062 }
 0x5bc   : > { %1065 = vst.msk [vmem:[#allocation5] sm:$0xff] %vm1059_vm5, %v1063_v58 }
 0x5bf   : > { %v1123_v24 = vpop.permute.xlu1 %1122  ;;  %v1086_v57 = vpop.permute.xlu0 %1085 }
 0x5c3   : > { %v1070_v59 = vld [vmem:[#allocation5] sm:$0xff]  ;;  %v1159_v28 = vpop.permute.xlu1 %1158 }
 0x5c4   : > { %v1133_v60 = vrot.slane %v1070_v59, %v2611_v41  ;;  %v1096_v61 = vrot.slane %v1070_v59, %v2608_v40  ;;  %v1205_v31 = vrot.slane %v1070_v59, %v2624_v49  ;;  %v1169_v62 = vrot.slane %v1070_v59, %v2619_v46 }
 0x5c5   : > { %v1241_v63 = vrot.slane %v1070_v59, %v2628_v51  ;;  %v1277_v1 = vrot.slane %v1070_v59, %v2632_v53  ;;  %v1313_v2 = vrot.slane %v1070_v59, %v2636_v55  ;;  %v1349_v3 = vrot.slane %v1070_v59, %v2616_v45 }
 0x5c6   : > { %1135 = vbcast.lane.b32.xlu1 %v1133_v60, 256  ;;  %1098 = vbcast.lane.b32.xlu0 %v1096_v61, 256 }
 0x5c7   : > { %v1195_v18 = vpop.permute.xlu1 %1194 }
 0x5ca   : > { %1207 = vbcast.lane.b32.xlu1 %v1205_v31, 256  ;;  %1171 = vbcast.lane.b32.xlu0 %v1169_v62, 256 }
 0x5cb   : > { %v1231_v48 = vpop.permute.xlu1 %1230 }
 0x5ce   : > { %1243 = vbcast.lane.b32.xlu1 %v1241_v63, 256  ;;  %1279 = vbcast.lane.b32.xlu0 %v1277_v1, 256 }
 0x5cf   : > { %v2664_v59 = vpop.permute.xlu1 %1266 }
 0x5d2   : > { %1315 = vbcast.lane.b32.xlu1 %v1313_v2, 256  ;;  %1351 = vbcast.lane.b32.xlu0 %v1349_v3, 256  ;;  %v2669_v3 = vpop.permute.xlu0 %1338 }
 0x678   : > { %v1036_v5 = vpop.f32.mrf.mxu1 }
 0x679   : > { %v1037_v6 = vadd.f32 %v1665_v4, %v1036_v5 }
 0x67a   : > { %v1723_v7 = vpop.f32.mrf.mxu1 }
 0x67b   : > { %v1043_v8 = vmin.f32 %v1037_v6, 20.0  ;;  %vm1042_vm8 = vcmp.gt.f32.partialorder %v1037_v6, 20.0 }
 0x67c   : > { %v1039_v9 = vpop.f32.mrf.mxu1 }
 0x67d   : > { %v1044_v10 = vmul.f32 1.442695, %v1043_v8  ;;  %v2672_v8 = vpop.permute.xlu1 %1302 }
 0x67e   : > { %v1724_v11 = vpop.f32.mrf.mxu1 }
 0x67f   : > { %1885 = vpow2.f32 %v1044_v10 }
 0x68c   : > { %v1886_v12 = vpop.eup %1885 }
 0x68d   : > { %v1046_v13 = vadd.f32 1.0, %v1886_v12  ;;  %v1049_v14 = vmul.f32 -0.5, %v1886_v12  ;;  %v1052_v16 = vand.u32 2147483647, %v1886_v12 }
 0x68f   : > { %1887 = vlog2.f32 %v1046_v13  ;;  %v1050_v15 = vadd.f32 1.0, %v1049_v14  ;;  %vm1053_vm7 = vcmp.lt.f32.partialorder %v1052_v16, 0.0004427343  ;;  %v1136_v16 = vpop.permute.xlu1 %1135 }
 0x691   : > { %v1051_v20 = vmul.f32 %v1886_v12, %v1050_v15  ;;  %v1099_v12 = vpop.permute.xlu0 %1098 }
 0x69c   : > { %v1888_v17 = vpop.eup %1887 }
 0x69d   : > { %v1048_v19 = vmul.f32 0.6931472, %v1888_v17 }
 0x69f   : > { %v1054_v21 = vsel %vm1053_vm7, %v1051_v20, %v1048_v19 }
 0x6a0   : > { %v1055_v22 = vsel %vm1042_vm8, %v1037_v6, %v1054_v21 }
 0x6a1   : > { %1056 = vst.msk [vmem:[#allocation2] sm:$0xff] %vm620_vm0, %v1055_v22  ;;  %v1057_v23 = vmul.f32 %v1055_v22, %v2592_v26 }
 0x6a3   : > { %1058 = vst.msk [vmem:[#allocation3] sm:$0xff] %vm620_vm0, %v1057_v23 }
 0x6a8   : > { %v1067_v25 = vld [vmem:[#allocation2] sm:$0xff] }
 0x6a9   : > { %v1071_v27 = vsub.f32 0.0, %v1067_v25  ;;  %v1385_v25 = vsub.f32 0.0, %v2565_v33 }
 0x6aa   : > { %v2659_v50 = vld [vmem:[#allocation3] sm:$0xff] }
 0x6ab   : > { %v1075_v30 = vrot.slane %v1071_v27, %v2608_v40  ;;  %v1112_v32 = vrot.slane %v1071_v27, %v2611_v41  ;;  %v1148_v36 = vrot.slane %v1071_v27, %v2619_v46  ;;  %v1184_v42 = vrot.slane %v1071_v27, %v2624_v49 }
 0x6ac   : > { %v1220_v47 = vrot.slane %v1071_v27, %v2628_v51  ;;  %v1256_v56 = vrot.slane %v1071_v27, %v2632_v53  ;;  %v1090_v58 = vrot.slane %v2659_v50, %v2608_v40  ;;  %v1292_v31 = vrot.slane %v1071_v27, %v2636_v55 }
 0x6ad   : > { %v1076_v34 = vmul.f32 %v1075_v30, %v1066_v29  ;;  %v1113_v35 = vmul.f32 %v1112_v32, %v1066_v29  ;;  %v1149_v39 = vmul.f32 %v1148_v36, %v1066_v29  ;;  %v1185_v44 = vmul.f32 %v1184_v42, %v1066_v29 }
 0x6ae   : > { %v1221_v54 = vmul.f32 %v1220_v47, %v1066_v29  ;;  %v1257_v61 = vmul.f32 %v1256_v56, %v1066_v29  ;;  %v1091_v1 = vmul.f32 %v1090_v58, %v1086_v57  ;;  %v1127_v2 = vrot.slane %v2659_v50, %v2611_v41 }
 0x6af   : > { %v1077_v37 = vmul.f32 1.442695, %v1076_v34  ;;  %v1114_v38 = vmul.f32 1.442695, %v1113_v35  ;;  %v1150_v43 = vmul.f32 1.442695, %v1149_v39  ;;  %v1328_v4 = vrot.slane %v1071_v27, %v2616_v45  ;;  %v1208_v35 = vpop.permute.xlu1 %1207 }
 0x6b0   : > { %v1186_v52 = vmul.f32 1.442695, %v1185_v44  ;;  %v1222_v60 = vmul.f32 1.442695, %v1221_v54  ;;  %v1258_v40 = vmul.f32 1.442695, %v1257_v61  ;;  %v1293_v6 = vmul.f32 %v1292_v31, %v1066_v29 }
 0x6b1   : > { %1889 = vpow2.f32 %v1077_v37  ;;  %v1128_v10 = vmul.f32 %v1127_v2, %v1123_v24  ;;  %v1163_v11 = vrot.slane %v2659_v50, %v2619_v46  ;;  %v1329_v14 = vmul.f32 %v1328_v4, %v1066_v29  ;;  %v1172_v46 = vpop.permute.xlu0 %1171 }
 0x6b2   : > { %1891 = vpow2.f32 %v1114_v38  ;;  %v1294_v41 = vmul.f32 1.442695, %v1293_v6  ;;  %v1199_v17 = vrot.slane %v2659_v50, %v2624_v49  ;;  %v1235_v29 = vrot.slane %v2659_v50, %v2628_v51 }
 0x6b3   : > { %1893 = vpow2.f32 %v1150_v43  ;;  %v1164_v20 = vmul.f32 %v1163_v11, %v1159_v28  ;;  %v1330_v23 = vmul.f32 1.442695, %v1329_v14  ;;  %v1386_v37 = vmul.f32 1.442695, %v1385_v25  ;;  %v1244_v57 = vpop.permute.xlu1 %1243 }
 0x6b4   : > { %1895 = vpow2.f32 %v1186_v52  ;;  %v1200_v27 = vmul.f32 %v1199_v17, %v1195_v18  ;;  %v1271_v38 = vrot.slane %v2659_v50, %v2632_v53  ;;  %v1236_v18 = vmul.f32 %v1235_v29, %v1231_v48 }
 0x6b5   : > { %1897 = vpow2.f32 %v1222_v60  ;;  %v1307_v53 = vrot.slane %v2659_v50, %v2636_v55  ;;  %v1343_v55 = vrot.slane %v2659_v50, %v2616_v45 }
 0x6b6   : > { %1899 = vpow2.f32 %v1258_v40  ;;  %v1272_v48 = vmul.f32 %v1271_v38, %v2664_v59 }
 0x6b7   : > { %1901 = vpow2.f32 %v1294_v41  ;;  %v1308_v11 = vmul.f32 %v1307_v53, %v2672_v8 }
 0x6b8   : > { %1903 = vpow2.f32 %v1330_v23 }
 0x6b9   : > { %1905 = vpow2.f32 %v1386_v37 }
 0x6be   : > { %v1890_v62 = vpop.eup %1889 }
 0x6bf   : > { %v1079_v63 = vmul.f32 0.0, %v1890_v62  ;;  %v1892_v7 = vpop.eup %1891 }
 0x6c0   : > { %v1894_v15 = vpop.eup %1893 }
 0x6c1   : > { %v1092_v5 = vadd.f32 %v1091_v1, %v1079_v63  ;;  %v1896_v24 = vpop.eup %1895 }
 0x6c2   : > { %v1898_v36 = vpop.eup %1897 }
 0x6c3   : > { %v1116_v9 = vmul.f32 %v1892_v7, %v1092_v5  ;;  %v1100_v30 = vmul.f32 %v1099_v12, %v1092_v5  ;;  %v1900_v56 = vpop.eup %1899  ;;  %v1280_v5 = vpop.permute.xlu0 %1279 }
 0x6c4   : > { %v1902_v4 = vpop.eup %1901 }
 0x6c5   : > { %v1129_v13 = vadd.f32 %v1128_v10, %v1116_v9  ;;  %v1102_v42 = vsel %vm1101_vm9, %v1100_v30, 0.0 }
 0x6c6   : > { %v1103_v58 = vrot.slane %v1102_v42, 4 }
 0x6c7   : > { %v1152_v19 = vmul.f32 %v1894_v15, %v1129_v13  ;;  %v1137_v21 = vmul.f32 %v1136_v16, %v1129_v13  ;;  %v1904_v15 = vpop.eup %1903  ;;  %v1316_v16 = vpop.permute.xlu1 %1315 }
 0x6c8   : > { %v1104_v40 = vadd.f32 %v1103_v58, %v1102_v42 }
 0x6c9   : > { %v1165_v22 = vadd.f32 %v1164_v20, %v1152_v19  ;;  %v1138_v49 = vsel %vm1101_vm9, %v1137_v21, 0.0 }
 0x6ca   : > { %v1139_v44 = vrot.slane %v1138_v49, 4  ;;  %v1105_v17 = vrot.slane %v1104_v40, 2 }
 0x6cb   : > { %v1173_v32 = vmul.f32 %v1172_v46, %v1165_v22  ;;  %v1188_v34 = vmul.f32 %v1896_v24, %v1165_v22  ;;  %v1344_v24 = vmul.f32 %v1343_v55, %v2669_v3  ;;  %v1667_v55 = vld [vmem:[#allocation19] ss:$0 sm:$0xff] }
 0x6cc   : > { %v1140_v62 = vadd.f32 %v1139_v44, %v1138_v49  ;;  %v1106_v30 = vadd.f32 %v1105_v17, %v1104_v40 }
 0x6cd   : > { %v1201_v28 = vadd.f32 %v1200_v27, %v1188_v34  ;;  %v1174_v39 = vsel %vm1101_vm9, %v1173_v32, 0.0  ;;  %v1352_v27 = vpop.permute.xlu0 %1351 }
 0x6ce   : > { %v1175_v47 = vrot.slane %v1174_v39, 4  ;;  %v1141_v12 = vrot.slane %v1140_v62, 2 }
 0x6cf   : > { %v1209_v43 = vmul.f32 %v1208_v35, %v1201_v28  ;;  %v1224_v51 = vmul.f32 %v1898_v36, %v1201_v28  ;;  %v1906_v35 = vpop.eup %1905 }
 0x6d0   : > { %v1176_v63 = vadd.f32 %v1175_v47, %v1174_v39  ;;  %v1142_v8 = vadd.f32 %v1141_v12, %v1140_v62  ;;  %v1388_v44 = vadd.f32 1.0, %v1906_v35 }
 0x6d1   : > { %v1210_v52 = vsel %vm1101_vm9, %v1209_v43, 0.0  ;;  %v1237_v54 = vadd.f32 %v1236_v18, %v1224_v51  ;;  %v1107_v18 = vrot.slane %v1106_v30, 1 }
 0x6d2   : > { %v1211_v60 = vrot.slane %v1210_v52, 4  ;;  %v1177_v59 = vrot.slane %v1176_v63, 2  ;;  %v1143_v36 = vrot.slane %v1142_v8, 1  ;;  %1907 = vrcp.f32 %v1388_v44 }
 0x6d3   : > { %v1245_v61 = vmul.f32 %v1244_v57, %v1237_v54  ;;  %v1260_v31 = vmul.f32 %v1900_v56, %v1237_v54 }
 0x6d4   : > { %v1212_v6 = vadd.f32 %v1211_v60, %v1210_v52  ;;  %v1178_v46 = vadd.f32 %v1177_v59, %v1176_v63  ;;  %v1144_v52 = vadd.f32 %v1143_v36, %v1142_v8  ;;  %v1108_v60 = vadd.f32 %v1107_v18, %v1106_v30 }
 0x6d5   : > { %v1246_v1 = vsel %vm1101_vm9, %v1245_v61, 0.0  ;;  %v1273_v2 = vadd.f32 %v1272_v48, %v1260_v31 }
 0x6d6   : > { %v1247_v7 = vrot.slane %v1246_v1, 4  ;;  %v1213_v19 = vrot.slane %v1212_v6, 2  ;;  %v1179_v39 = vrot.slane %v1178_v46, 1 }
 0x6d7   : > { %v1281_v9 = vmul.f32 %v1280_v5, %v1273_v2  ;;  %v1296_v10 = vmul.f32 %v1902_v4, %v1273_v2 }
 0x6d8   : > { %v1248_v13 = vadd.f32 %v1247_v7, %v1246_v1  ;;  %v1214_v29 = vadd.f32 %v1213_v19, %v1212_v6  ;;  %v1180_v58 = vadd.f32 %v1179_v39, %v1178_v46  ;;  %v1361_v1 = vsel %vm996_vm4, %v1108_v60, %v1144_v52 }
 0x6d9   : > { %v1282_v41 = vsel %vm1101_vm9, %v1281_v9, 0.0  ;;  %v1309_v14 = vadd.f32 %v1308_v11, %v1296_v10 }
 0x6da   : > { %v1283_v20 = vrot.slane %v1282_v41, 4  ;;  %v1249_v21 = vrot.slane %v1248_v13, 2  ;;  %v1215_v42 = vrot.slane %v1214_v29, 1  ;;  %v1363_v4 = vsel %vm1362_vm10, %v1361_v1, %v1180_v58 }
 0x6db   : > { %v1317_v22 = vmul.f32 %v1316_v16, %v1309_v14  ;;  %v1332_v23 = vmul.f32 %v1904_v15, %v1309_v14 }
 0x6dc   : > { %v1284_v25 = vadd.f32 %v1283_v20, %v1282_v41  ;;  %v1250_v49 = vadd.f32 %v1249_v21, %v1248_v13  ;;  %v1216_v53 = vadd.f32 %v1215_v42, %v1214_v29  ;;  %v1383_v13 = vmul.f32 %v1667_v55, %v2592_v26 }
 0x6dd   : > { %v1318_v45 = vsel %vm1101_vm9, %v1317_v22, 0.0  ;;  %v1345_v50 = vadd.f32 %v1344_v24, %v1332_v23  ;;  %v1876_v23 = vld [vmem:[#allocation21] sm:$0xff]  }
 0x6de   : > { %v1285_v32 = vrot.slane %v1284_v25, 2  ;;  %v1319_v34 = vrot.slane %v1318_v45, 4  ;;  %v1251_v47 = vrot.slane %v1250_v49, 1  ;;  %v1365_v40 = vsel %vm1364_vm11, %v1363_v4, %v1216_v53  ;;  %1726 = vmatpush3.bf16.msra.mxu0 %v1876_v23 }
 0x6df   : > { %v1353_v28 = vmul.f32 %v1352_v27, %v1345_v50  ;;  %v1908_v12 = vpop.eup %1907 }
 0x6e0   : > { %v1286_v37 = vadd.f32 %v1285_v32, %v1284_v25  ;;  %v1320_v38 = vadd.f32 %v1319_v34, %v1318_v45  ;;  %v1252_v48 = vadd.f32 %v1251_v47, %v1250_v49  ;;  %v1391_v14 = vmul.f32 %v1908_v12, %v2565_v33  ;;  %v1668_v45 = vld [vmem:[%s2823_s17] ss:$0 sm:$0xff] }
 0x6e1   : > { %v1354_v3 = vsel %vm1101_vm9, %v1353_v28, 0.0 }
 0x6e2   : > { %v1321_v43 = vrot.slane %v1320_v38, 2  ;;  %v1355_v51 = vrot.slane %v1354_v3, 4  ;;  %v1287_v54 = vrot.slane %v1286_v37, 1  ;;  %v1367_v6 = vsel %vm1366_vm12, %v1365_v40, %v1252_v48 }
 0x6e4   : > { %v1322_v56 = vadd.f32 %v1321_v43, %v1320_v38  ;;  %v1356_v57 = vadd.f32 %v1355_v51, %v1354_v3  ;;  %v1288_v62 = vadd.f32 %v1287_v54, %v1286_v37 }
 0x6e6   : > { %v1323_v61 = vrot.slane %v1322_v56, 1  ;;  %v1357_v31 = vrot.slane %v1356_v57, 2  ;;  %v1369_v9 = vsel %vm1368_vm13, %v1367_v6, %v1288_v62 }
 0x6e8   : > { %v1358_v63 = vadd.f32 %v1357_v31, %v1356_v57  ;;  %v1324_v2 = vadd.f32 %v1323_v61, %v1322_v56 }
 0x6ea   : > { %v1359_v5 = vrot.slane %v1358_v63, 1  ;;  %v1371_v10 = vsel %vm1370_vm14, %v1369_v9, %v1324_v2 }
 0x6ec   : > { %v1360_v7 = vadd.f32 %v1359_v5, %v1358_v63 }
 0x6ee   : > { %v1373_v11 = vsel %vm1372_vm15, %v1371_v10, %v1360_v7 }
 0x6ef   : > { %1374 = vst.msk [vmem:[#allocation6] sm:$0xff] %vm620_vm0, %v1373_v11 }
 0x6f6   : > { %v1375_v59 = vld [vmem:[#allocation6] sm:$0xff] }
 0x6f7   : > { %v1384_v41 = vadd.f32 %v1383_v13, %v1375_v59 }
 0x6f9   : > { %v1392_v15 = vmul.f32 %v1391_v14, %v1384_v41 }
 0x6fb   : > { %v1393_v16 = vsel %vm620_vm0, %v1392_v15, 0.0 }
 0x6fc   : > { %1394 = vadd.xlane.f32.xlu1 %v1393_v16 }
 0x785   : > { %v1395_v17 = vpop.xlane.xlu1 %1394 }
 0x786   : > { %v1397_v19 = vmul.f32 0.0625, %v1395_v17 }
 0x788   : > { %v1398_v20 = vsub.f32 %v1392_v15, %v1397_v19 }
 0x78a   : > { %v1399_v21 = vmul.f32 %v1398_v20, %v1398_v20 }
 0x78c   : > { %v1400_v22 = vsel %vm620_vm0, %v1399_v21, 0.0 }
 0x78d   : > { %1401 = vadd.xlane.f32.xlu0 %v1400_v22 }
 0x816   : > { %v1402_v26 = vpop.xlane.xlu0 %1401 }
 0x817   : > { %v1403_v24 = vmul.f32 0.0625, %v1402_v26 }
 0x819   : > { %v1404_v8 = vadd.f32 1e-05, %v1403_v24 }
 0x81b   : > { %1909 = vrsqrt.f32 %v1404_v8 }
 0x828   : > { %v1910_v33 = vpop.eup %1909 }
 0x829   : > { %v1406_v25 = vmul.f32 %v1910_v33, %v1398_v20 }
 0x82b   : > { %v1407_v46 = vpack.c.bf16 %v1406_v25, %v1406_v25 }
 0x82d   : > { %1728 = vmatmul.mubr.msk.bf16.vlgmr.msra.gmra.mxu0 %vm620_vm0, %v1407_v46 }
 0x8ed   : > { %v1460_v50 = vpop.f32.mrf.mxu0 }
 0x8ee   : > { %v1461_v27 = vadd.f32 %v1668_v45, %v1460_v50 }
 0x8ef   : > { %v1729_v30 = vpop.f32.mrf.mxu0 }
 0x8f0   : > { %v1466_v29 = vadd.f32 %v1461_v27, %v2545_v0 }
 0x8f1   : > { %v1463_v32 = vpop.f32.mrf.mxu0 }
 0x8f2   : > { %1467 = vst.msk [vmem:[%s617_s1] sm:$0xff] %vm620_vm0, %v1466_v29 }
 0x8f3   : > { %v1730_v34 = vpop.f32.mrf.mxu0 }
 0x8f4   : > { %2160 = shalt.err (!%p2157_p10)
}
 0x8f5   : > { %s2161_s6 = scalar_lea.hbm %s2715_s13, 128  ;;  %s2165_s22 = scalar_lea.hbm %s2824_s8, 256 }
 0x8f6   : > { %p2162_p11 = scmp.ne.s32.totalorder %s2715_s13, %s2161_s6  ;;  %p2166_p4 = scmp.lt.s32.totalorder %s2715_s13, %s2824_s8 }
 0x8f7   : > { %p2167_p5 = scmp.lt.s32.totalorder %s2165_s22, %s2161_s6 }
 0x8f8   : > { %p2163_p12 = pnand %p2162_p11, %p2825_p9 }
 0x8f9   : > { %p2168_p1 = por %p2167_p5, %p2166_p4 }
 0x8fa   : > { %p2164_p0 = pneg %p2163_p12 }
 0x8fc   : > { %p2169_p8 = pnand %p2168_p1, %p2164_p0 }
 0x8fe   : > { %2172 = shalt.err (!%p2169_p8)
}
 0x8ff   : > { %1771 = dma.vmem_to_hbm [thread:$0]  (%p2825_p9), %s2717_s28, 128, %s2715_s13, %s1469_s24  }
 0x900 PF: > { %s1494_s1 = sand.u32 1, %s2215_s18   ;;  %p2826_p7 = scmp.ne.s32.totalorder %s2811_s26, 0 }
 0x901   : > { %p2827_p13 = scmp.ge.s32.totalorder %s2227_s21, 2  ;;  %s1495_s30 = scalar_lea.sflag [#allocation9], %s1494_s1 }
 0x903   : > { %p1803_p2 = pnand %p2827_p13, %p2826_p7 }
 0x905   : > { %p1804_p6 = pneg %p1803_p2 }
 0x907   : > { %2210 = dma.done.wait (%p1804_p6), %s1495_s30, 128  }
 0x908   : > { %2212 = vsyncadd (%p1804_p6), %s1495_s30, 4294967168  ;;  %p32_p3 = scmp.ge.s32.totalorder %s2456_s16, 4   ;;  %s2828_s18 = smov %s2219_s19 }
 0x909   : > { %s2829_s19 = smov %s2223_s20  ;;  %s2830_s20 = smov %s2467_s23 }
 0x90a   : > { %s2831_s21 = smov %s2456_s16  ;;  %34 = sbr.rel (!%p32_p3) target bundleno = 20 (0x14), region = 157 }
 0x90f   :  { %1500 = vsyncpa [#allocation8], 1 }
 0x910   :  { %1502 = vsyncpa [#allocation8 + $0x1], 1 }
 0x911   :  { %1503 = vsyncpa [#allocation11], 1 }
 0x912   :  { %1504 = vsyncpa [#allocation14], 1 }
 0x913   :  { %1505 = vsyncpa [#allocation17], 1 }
 0x914   :  { %1506 = vsyncpa [#allocation20], 1 }
 0x915   :  { %1507 = vsyncpa [#allocation9], 1 }
 0x916   :  { %1509 = vsyncpa [#allocation9 + $0x1], 1 }

</bundles_post_ra>
